<compile_context>
chip_gen: v7x
topology: tpu7x:2x2x1
jax: 0.10.0
libtpu: 0.0.40
codegen_flags: <defaults>
</compile_context>

<pallas_src>
import jax
import jax.numpy as jnp
from jax.experimental import pallas as pl
from jax.experimental.pallas import tpu as pltpu


def _round_up(n, m):
    return ((n + m - 1) // m) * m


def _regressor_kernel(x_ref, w1_ref, b1_ref, w2_ref, b2_ref, o_ref):
    # fc1: [TB, P*I] @ [P*I, P*H] (block-diagonal) -> f32 accumulation on MXU.
    h = jnp.dot(x_ref[...], w1_ref[...], preferred_element_type=jnp.float32)
    # bias + ReLU on the VPU, in f32.
    h = jnp.maximum(h + b1_ref[...], 0.0)
    # fc2: [TB, P*H] @ [P*H, P*O]; keep MXU operands in the weight dtype
    # (no-op for f32 weights, single cheap VPU pass for bf16 weights).
    out = jnp.dot(h.astype(w2_ref.dtype), w2_ref[...],
                  preferred_element_type=jnp.float32)
    o_ref[...] = (out + b2_ref[...]).astype(o_ref.dtype)


def simple_regressor(x, w1, b1, w2, b2, *, pack=16, block_rows=512,
                     min_pallas_batch=1024, core_parallel=False):
    """y = relu(x @ w1 + b1) @ w2 + b2.

    x: [B, I]; w1: [I, H]; b1: [1, H] (or [H]); w2: [H, O]; b2: [1, O] (or [O]).
    Returns f32 [B, O].  Pass x / w1 / w2 as bf16 to use the bf16 MXU path
    (accumulation stays f32).
    """
    B, I = x.shape
    H = w1.shape[1]
    O = w2.shape[1]

    # --- Small-batch fast path: a kernel launch is pure overhead here. ------
    if B < min_pallas_batch:
        h = jnp.maximum(jnp.dot(x, w1) + b1.reshape(1, H), 0.0)
        y = jnp.dot(h.astype(w2.dtype), w2) + b2.reshape(1, O)
        return y.astype(jnp.float32)

    # --- Lane-dense packing: P original rows per packed row. ----------------
    P = int(pack)
    assert block_rows % 8 == 0, "block_rows must be sublane (8) aligned"
    rows = pl.cdiv(B, P)                      # packed rows needed
    if rows <= block_rows:
        TB = _round_up(rows, 8)               # one sublane-aligned block
    else:
        TB = block_rows                       # multi-step grid, ragged last block
    rows_alloc = max(rows, TB)
    B_alloc = rows_alloc * P
    if B_alloc != B:
        # Only hit for tiny batches or B % pack != 0 (<= TB*P extra rows for
        # the tiny case, <= pack-1 otherwise).  Large batches that are a
        # multiple of `pack` never go through jnp.pad.
        x = jnp.pad(x, ((0, B_alloc - B), (0, 0)))
    x_p = x.reshape(rows_alloc, P * I)        # rows of P*I = 512 lanes (f32: 2 KiB)

    # Block-diagonal packed weights / tiled biases (parameters: precompute in
    # real use).  kron(eye, W) keeps the weight dtype (bf16 stays bf16).
    w1_bd = jnp.kron(jnp.eye(P, dtype=w1.dtype), w1)        # [P*I, P*H]
    w2_bd = jnp.kron(jnp.eye(P, dtype=w2.dtype), w2)        # [P*H, P*O]
    b1_p = jnp.tile(b1.astype(jnp.float32).reshape(1, H), (1, P))   # [1, P*H]
    b2_p = jnp.tile(b2.astype(jnp.float32).reshape(1, O), (1, P))   # [1, P*O]

    grid = (pl.cdiv(rows_alloc, TB),)
    # CORE_PARALLEL actually splits the batch axis across v7x's two
    # TensorCores; plain PARALLEL is the portable default.
    batch_sem = pltpu.CORE_PARALLEL if core_parallel else pltpu.PARALLEL

    out_p = pl.pallas_call(
        _regressor_kernel,
        out_shape=jax.ShapeDtypeStruct((rows_alloc, P * O), jnp.float32),
        grid=grid,
        in_specs=[
            # Activations: tiled along the (packed) batch axis, double-buffered
            # by the BlockSpec pipeliner.  Last block may be partial (masked).
            pl.BlockSpec((TB, P * I), lambda i: (i, 0)),
            # Weights / biases: whole arrays resident in VMEM, loaded once.
            pl.BlockSpec(memory_space=pltpu.MemorySpace.VMEM),
            pl.BlockSpec(memory_space=pltpu.MemorySpace.VMEM),
            pl.BlockSpec(memory_space=pltpu.MemorySpace.VMEM),
            pl.BlockSpec(memory_space=pltpu.MemorySpace.VMEM),
        ],
        # Output rows are P*O = 128 lanes: lane-dense, unmasked stores.
        out_specs=pl.BlockSpec((TB, P * O), lambda i: (i, 0)),
        compiler_params=pltpu.CompilerParams(
            dimension_semantics=(batch_sem,),
        ),
    )(x_p, w1_bd, b1_p, w2_bd, b2_p)

    out = out_p.reshape(rows_alloc * P, O)
    return out[:B] if B_alloc != B else out


def reference(x, w1, b1, w2, b2):
    h = jnp.maximum(x @ w1 + b1, 0.0)
    return h @ w2 + b2


if __name__ == "__main__":
    # Module hyperparameters (SMALL, consistent with the PyTorch module):
    batch_size = 8
    input_size = 32
    hidden_size = 64
    noutputs = 8

    key = jax.random.PRNGKey(0)
    kx, k1, k2, k3, k4 = jax.random.split(key, 5)

    x = jax.random.normal(kx, (batch_size, input_size), dtype=jnp.float32)

    # Deterministic parameter init (uniform, like nn.Linear's default scale).
    bound1 = 1.0 / (input_size ** 0.5)
    w1 = jax.random.uniform(k1, (input_size, hidden_size), jnp.float32,
                            -bound1, bound1)
    b1 = jax.random.uniform(k2, (1, hidden_size), jnp.float32, -bound1, bound1)
    bound2 = 1.0 / (hidden_size ** 0.5)
    w2 = jax.random.uniform(k3, (hidden_size, noutputs), jnp.float32,
                            -bound2, bound2)
    b2 = jax.random.uniform(k4, (1, noutputs), jnp.float32, -bound2, bound2)

    ref_small = reference(x, w1, b1, w2, b2)

    # 1) Module config (B=8) through the small-batch fast path (fused XLA).
    out_small = simple_regressor(x, w1, b1, w2, b2)
    jax.block_until_ready(out_small)
    assert out_small.shape == (batch_size, noutputs)
    assert jnp.allclose(out_small, ref_small, atol=1e-5, rtol=1e-5)

    # 2) Same module config forced through the Pallas kernel (single tiny
    #    packed block), f32, tight check.
    out_k = simple_regressor(x, w1, b1, w2, b2, min_pallas_batch=0)
    jax.block_until_ready(out_k)
    assert out_k.shape == (batch_size, noutputs)
    assert jnp.allclose(out_k, ref_small, atol=1e-4, rtol=1e-4)

    # 3) Large f32 batch: multi-step grid, ragged (masked) last block, no pad
    #    (20000 is a multiple of pack=16 but not of 16*512).
    big_B = 20000
    xb = jax.random.normal(jax.random.PRNGKey(1), (big_B, input_size),
                           dtype=jnp.float32)
    ref_big = reference(xb, w1, b1, w2, b2)

    out_big = simple_regressor(xb, w1, b1, w2, b2)
    jax.block_until_ready(out_big)
    assert out_big.shape == (big_B, noutputs)
    assert jnp.allclose(out_big, ref_big, atol=1e-3, rtol=1e-3)

    # 4) Same large batch with bf16 HBM storage of x and the weights
    #    (halves the dominant input stream; f32 accumulation), loose check.
    out_bf16 = simple_regressor(xb.astype(jnp.bfloat16),
                                w1.astype(jnp.bfloat16), b1,
                                w2.astype(jnp.bfloat16), b2)
    jax.block_until_ready(out_bf16)
    assert out_bf16.shape == (big_B, noutputs)
    assert jnp.allclose(out_bf16, ref_big, atol=5e-2, rtol=5e-2)

    # TODO(synk): nn.MSELoss criterion / training loop are not part of
    # forward() and are intentionally not translated.
    print("KERNEL_OK")
</pallas_src>

<mosaic_0001>
module attributes {stable_mosaic.version = 11 : i64} {
  func.func @_regressor_kernel(%arg0: i32, %arg1: memref<8x512xf32, #tpu.memory_space<vmem>>, %arg2: memref<512x1024xf32, #tpu.memory_space<vmem>>, %arg3: memref<1x1024xf32, #tpu.memory_space<vmem>>, %arg4: memref<1024x128xf32, #tpu.memory_space<vmem>>, %arg5: memref<1x128xf32, #tpu.memory_space<vmem>>, %arg6: memref<8x128xf32, #tpu.memory_space<vmem>>) attributes {dimension_semantics = [#tpu.dimension_semantics<parallel>], iteration_bounds = array<i64: 1>, scalar_prefetch = 0 : i64, scratch_operands = 0 : i64, tpu.core_type = #tpu.core_type<tc>, window_params = [{transform_indices = @transform_0, window_bounds = array<i64: 8, 512>}, {pipeline_mode = #tpu.pipeline_mode<synchronous>, transform_indices = @transform_1, window_bounds = array<i64: 512, 1024>}, {pipeline_mode = #tpu.pipeline_mode<synchronous>, transform_indices = @transform_2, window_bounds = array<i64: 1, 1024>}, {pipeline_mode = #tpu.pipeline_mode<synchronous>, transform_indices = @transform_3, window_bounds = array<i64: 1024, 128>}, {pipeline_mode = #tpu.pipeline_mode<synchronous>, transform_indices = @transform_4, window_bounds = array<i64: 1, 128>}, {transform_indices = @transform_5, window_bounds = array<i64: 8, 128>}]} {
    %c0 = arith.constant 0 : index
    %c0_0 = arith.constant 0 : index
    %0 = vector.load %arg1[%c0, %c0_0] : memref<8x512xf32, #tpu.memory_space<vmem>>, vector<8x512xf32>
    %c0_1 = arith.constant 0 : index
    %c0_2 = arith.constant 0 : index
    %1 = vector.load %arg2[%c0_1, %c0_2] : memref<512x1024xf32, #tpu.memory_space<vmem>>, vector<512x1024xf32>
    %cst = arith.constant dense<0.000000e+00> : vector<8x1024xf32>
    %2 = tpu.matmul %0, %1, %cst {dimension_numbers = #tpu.dot_dimension_numbers<[1], [0], [0], [1], [0, 0, 1, 1], [], []>} : vector<8x512xf32>, vector<512x1024xf32>, vector<8x1024xf32> -> vector<8x1024xf32>
    %c0_3 = arith.constant 0 : index
    %c0_4 = arith.constant 0 : index
    %3 = vector.load %arg3[%c0_3, %c0_4] : memref<1x1024xf32, #tpu.memory_space<vmem>>, vector<1x1024xf32>
    %4 = vector.broadcast %3 : vector<1x1024xf32> to vector<8x1024xf32>
    %5 = arith.addf %2, %4 : vector<8x1024xf32>
    %cst_5 = arith.constant 0.000000e+00 : f32
    %6 = vector.broadcast %cst_5 : f32 to vector<8x1024xf32>
    %7 = arith.maximumf %5, %6 : vector<8x1024xf32>
    %c0_6 = arith.constant 0 : index
    %c0_7 = arith.constant 0 : index
    %8 = vector.load %arg4[%c0_6, %c0_7] : memref<1024x128xf32, #tpu.memory_space<vmem>>, vector<1024x128xf32>
    %cst_8 = arith.constant dense<0.000000e+00> : vector<8x128xf32>
    %9 = tpu.matmul %7, %8, %cst_8 {dimension_numbers = #tpu.dot_dimension_numbers<[1], [0], [0], [1], [0, 0, 1, 1], [], []>} : vector<8x1024xf32>, vector<1024x128xf32>, vector<8x128xf32> -> vector<8x128xf32>
    %c0_9 = arith.constant 0 : index
    %c0_10 = arith.constant 0 : index
    %10 = vector.load %arg5[%c0_9, %c0_10] : memref<1x128xf32, #tpu.memory_space<vmem>>, vector<1x128xf32>
    %11 = vector.broadcast %10 : vector<1x128xf32> to vector<8x128xf32>
    %12 = arith.addf %9, %11 : vector<8x128xf32>
    %c0_11 = arith.constant 0 : index
    %c0_12 = arith.constant 0 : index
    %13 = vector.load %arg6[%c0_11, %c0_12] : memref<8x128xf32, #tpu.memory_space<vmem>>, vector<8x128xf32>
    tpu.vector_store %arg6[%c0_11, %c0_12], %12 {strides = array<i32>} : memref<8x128xf32, #tpu.memory_space<vmem>>, vector<8x128xf32>,
    return
  }
  func.func @transform_0(%arg0: i32) -> (i32, i32) {
    %c0_i32 = arith.constant 0 : i32
    %c0_i32_0 = arith.constant 0 : i32
    return %arg0, %c0_i32 : i32, i32
  }
  func.func @transform_1(%arg0: i32) -> (i32, i32) {
    %c0_i32 = arith.constant 0 : i32
    %c0_i32_0 = arith.constant 0 : i32
    %c0_i32_1 = arith.constant 0 : i32
    return %c0_i32, %c0_i32_0 : i32, i32
  }
  func.func @transform_2(%arg0: i32) -> (i32, i32) {
    %c0_i32 = arith.constant 0 : i32
    %c0_i32_0 = arith.constant 0 : i32
    %c0_i32_1 = arith.constant 0 : i32
    return %c0_i32, %c0_i32_0 : i32, i32
  }
  func.func @transform_3(%arg0: i32) -> (i32, i32) {
    %c0_i32 = arith.constant 0 : i32
    %c0_i32_0 = arith.constant 0 : i32
    %c0_i32_1 = arith.constant 0 : i32
    return %c0_i32, %c0_i32_0 : i32, i32
  }
  func.func @transform_4(%arg0: i32) -> (i32, i32) {
    %c0_i32 = arith.constant 0 : i32
    %c0_i32_0 = arith.constant 0 : i32
    %c0_i32_1 = arith.constant 0 : i32
    return %c0_i32, %c0_i32_0 : i32, i32
  }
  func.func @transform_5(%arg0: i32) -> (i32, i32) {
    %c0_i32 = arith.constant 0 : i32
    %c0_i32_0 = arith.constant 0 : i32
    return %arg0, %c0_i32 : i32, i32
  }
}

</mosaic_0001>

<bundles_post_ra>
// kernel: tpu_custom_call.1
= control target key start
LH: loop header
LB: loop body
LE: loop exit
PB: predicated region body
PF: predicated region fallthrough
CT: control target
= control target key end

     0   :  { %10 = vsyncpa [#allocation3], 0  ;;  %s2743_s0 = inlined_call_operand.hbm [shape: f32[8,512], index: 0, kind: input, shape index: {}]   ;;  %s2744_s1 = inlined_call_operand.hbm [shape: f32[512,1024], index: 1, kind: input, shape index: {}]   ;;  %s2745_s2 = inlined_call_operand.hbm [shape: f32[1,1024], index: 2, kind: input, shape index: {}]   ;;  %s2746_s3 = inlined_call_operand.hbm [shape: f32[1024,128], index: 3, kind: input, shape index: {}]   ;;  %s2747_s4 = inlined_call_operand.hbm [shape: f32[1,128], index: 4, kind: input, shape index: {}]   ;;  %s2748_s5 = inlined_call_operand.hbm [shape: f32[8,128], index: 5, kind: output, shape index: {}]  }
   0x1   :  { %11 = vsyncpa [#allocation6], 0 }
   0x2   :  { %12 = vsyncpa [#allocation9], 0 }
   0x3   :  { %13 = vsyncpa [#allocation4], 0  ;;  %s2599_s18 = smov [#allocation5]   ;;  %s2459_s22 = scalar_lea.hbm %s2744_s1, 65536 }
   0x4   :  { %s29_s19 = sshll.u32 %s2599_s18, 4  ;;  %p2460_p0 = scmp.ne.s32.totalorder %s2744_s1, %s2459_s22  ;;  %s30_s19 = int_to_ptr.vmem [resolvable:$true] %s29_s19 }
   0x5   :  { %p2463_p1 = scmp.lt.u32.totalorder %s2459_s22, %s2744_s1 }
   0x7   :  { %p2465_p2 = pnand %p2463_p1, %p2460_p0 }
   0x9   :  { %2468 = shalt.err (!%p2465_p2)
}
   0xa   :  { %s2469_s27 = scalar_lea.vmem %s30_s19, 65536  ;;  %p2474_p4 = scmp.lt.s32.totalorder %s30_s19, %s30_s19 }
   0xb   :  { %p2470_p3 = scmp.ne.s32.totalorder %s30_s19, %s2469_s27  ;;  %p2475_p5 = scmp.lt.s32.totalorder %s2469_s27, %s2469_s27 }
   0xd   :  { %p2476_p6 = por %p2475_p5, %p2474_p4 }
   0xf   :  { %p2477_p7 = pnand %p2476_p6, %p2470_p3 }
  0x11   :  { %2480 = shalt.err (!%p2477_p7)
}
  0x12   :  { %s2600_s28 = smov 1024   ;;  %s2601_s29 = smov 64  }
  0x13   :  { %35 = dma.hbm_to_vmem [thread:$0]  %s2744_s1, 65536, %s30_s19, [#allocation6], %s2600_s28, %s2600_s28, %s2601_s29  }
  0x14   :  { %s2602_s7 = smov [#allocation8]   ;;  %s2481_s11 = scalar_lea.hbm %s2746_s3, 16384 }
  0x15   :  { %s51_s8 = sshll.u32 %s2602_s7, 4  ;;  %p2482_p8 = scmp.ne.s32.totalorder %s2746_s3, %s2481_s11  ;;  %s52_s8 = int_to_ptr.vmem [resolvable:$true] %s51_s8 }
  0x16   :  { %p2485_p9 = scmp.lt.u32.totalorder %s2481_s11, %s2746_s3 }
  0x18   :  { %p2487_p10 = pnand %p2485_p9, %p2482_p8 }
  0x1a   :  { %2490 = shalt.err (!%p2487_p10)
}
  0x1b   :  { %s2491_s16 = scalar_lea.vmem %s52_s8, 16384  ;;  %p2496_p12 = scmp.lt.s32.totalorder %s52_s8, %s52_s8 }
  0x1c   :  { %p2492_p11 = scmp.ne.s32.totalorder %s52_s8, %s2491_s16  ;;  %p2497_p13 = scmp.lt.s32.totalorder %s2491_s16, %s2491_s16 }
  0x1e   :  { %p2498_p0 = por %p2497_p13, %p2496_p12 }
  0x20   :  { %p2499_p1 = pnand %p2498_p0, %p2492_p11 }
  0x22   :  { %2502 = shalt.err (!%p2499_p1)
}
  0x23   :  { %s2603_s1 = smov 128   ;;  %s2604_s17 = smov 8  }
  0x24   :  { %57 = dma.hbm_to_vmem [thread:$0]  %s2746_s3, 16384, %s52_s8, [#allocation9], %s2603_s1, %s2603_s1, %s2604_s17  }
  0x25   :  { %s2605_s20 = smov [#allocation2]   ;;  %s2606_s22 = smov [#allocation7]  }
  0x26   :  { %s20_s21 = sshll.u32 %s2605_s20, 4  ;;  %s42_s23 = sshll.u32 %s2606_s22, 4  ;;  %s21_s21 = int_to_ptr.vmem [resolvable:$true] %s20_s21  ;;  %s43_s23 = int_to_ptr.vmem [resolvable:$true] %s42_s23 }
  0x27   :  { %s2503_s26 = scalar_lea.hbm %s2743_s0, 512 }
  0x28   :  { %p2504_p2 = scmp.ne.s32.totalorder %s2743_s0, %s2503_s26  ;;  %p2507_p3 = scmp.lt.u32.totalorder %s2503_s26, %s2743_s0 }
  0x2a   :  { %p2509_p4 = pnand %p2507_p3, %p2504_p2 }
  0x2c   :  { %2512 = shalt.err (!%p2509_p4)
}
  0x2d   :  { %s2513_s3 = scalar_lea.vmem %s21_s21, 512  ;;  %p2518_p6 = scmp.lt.s32.totalorder %s21_s21, %s21_s21 }
  0x2e   :  { %p2514_p5 = scmp.ne.s32.totalorder %s21_s21, %s2513_s3  ;;  %p2519_p7 = scmp.lt.s32.totalorder %s2513_s3, %s2513_s3 }
  0x30   :  { %p2520_p8 = por %p2519_p7, %p2518_p6 }
  0x32   :  { %p2521_p9 = pnand %p2520_p8, %p2514_p5 }
  0x34   :  { %2524 = shalt.err (!%p2521_p9)
}
  0x35   :  { %23 = dma.hbm_to_vmem [thread:$0]  %s2743_s0, 512, %s21_s21, [#allocation3]  }
  0x36   :  { %s2525_s10 = scalar_lea.hbm %s2745_s2, 128 }
  0x37   :  { %p2526_p10 = scmp.ne.s32.totalorder %s2745_s2, %s2525_s10  ;;  %p2529_p11 = scmp.lt.u32.totalorder %s2525_s10, %s2745_s2 }
  0x39   :  { %p2531_p12 = pnand %p2529_p11, %p2526_p10 }
  0x3b   :  { %2534 = shalt.err (!%p2531_p12)
}
  0x3c   :  { %s2535_s15 = scalar_lea.vmem %s43_s23, 128  ;;  %p2540_p0 = scmp.lt.s32.totalorder %s43_s23, %s43_s23 }
  0x3d   :  { %p2536_p13 = scmp.ne.s32.totalorder %s43_s23, %s2535_s15  ;;  %p2541_p1 = scmp.lt.s32.totalorder %s2535_s15, %s2535_s15 }
  0x3f   :  { %p2542_p2 = por %p2541_p1, %p2540_p0 }
  0x41   :  { %p2543_p3 = pnand %p2542_p2, %p2536_p13 }
  0x43   :  { %2546 = shalt.err (!%p2543_p3)
}
  0x44   :  { %45 = dma.hbm_to_vmem [thread:$0]  %s2745_s2, 128, %s43_s23, [#allocation6]  }
  0x45   :  { %s2607_s1 = smov [#allocation10]   ;;  %s2547_s20 = scalar_lea.hbm %s2747_s4, 16 }
  0x46   :  { %s64_s17 = sshll.u32 %s2607_s1, 4  ;;  %p2548_p4 = scmp.ne.s32.totalorder %s2747_s4, %s2547_s20  ;;  %s65_s17 = int_to_ptr.vmem [resolvable:$true] %s64_s17 }
  0x47   :  { %p2551_p5 = scmp.lt.u32.totalorder %s2547_s20, %s2747_s4 }
  0x49   :  { %p2553_p6 = pnand %p2551_p5, %p2548_p4 }
  0x4b   :  { %2556 = shalt.err (!%p2553_p6)
}
  0x4c   :  { %s2557_s26 = scalar_lea.vmem %s65_s17, 16  ;;  %s2561_s2 = scalar_lea.vmem %s65_s17, 32 }
  0x4d   :  { %p2558_p7 = scmp.ne.s32.totalorder %s65_s17, %s2557_s26  ;;  %p2562_p8 = scmp.lt.s32.totalorder %s65_s17, %s65_s17 }
  0x4e   :  { %p2563_p9 = scmp.lt.s32.totalorder %s2561_s2, %s2557_s26 }
  0x50   :  { %p2564_p10 = por %p2563_p9, %p2562_p8 }
  0x52   :  { %p2565_p11 = pnand %p2564_p10, %p2558_p7 }
  0x54   :  { %2568 = shalt.err (!%p2565_p11)
}
  0x55   :  { %67 = dma.hbm_to_vmem [thread:$0]  %s2747_s4, 16, %s65_s17, [#allocation9]  }
  0x56   :  { %2591 = dma.done.wait [#allocation3], 512  }
  0x57   :  { %2592 = vsyncadd [#allocation3], 4294966784 }
  0x58   :  { %2593 = dma.done.wait [#allocation6], 65664  }
  0x59   :  { %2594 = vsyncadd [#allocation6], 4294901632 }
  0x5a   :  { %2595 = dma.done.wait [#allocation9], 16400  }
  0x5b   :  { %2596 = vsyncadd [#allocation9], 4294950896  ;;  %v88_v0 = vld [vmem:[#allocation5 + $0x8] sm:$0xff]  ;;  %v90_v2 = vld [vmem:[#allocation5 + $0x18] sm:$0xff]  ;;  %s2608_s4 = smov [#allocation11]  }
  0x5c   :  { %v96_v1 = vld [vmem:[#allocation5 + $0x48] sm:$0xff]  ;;  %v98_v4 = vld [vmem:[#allocation5 + $0x58] sm:$0xff]  ;;  %v87_v5 = vld [vmem:[#allocation5] sm:$0xff]  ;;  %s1639_s28 = sshll.u32 %s2608_s4, 4  ;;  %s1640_s28 = int_to_ptr.vmem [resolvable:$true] %s1639_s28 }
  0x5d   :  { %v1791_v3 = vpack.c.bf16 %v96_v1, %v88_v0  ;;  %v95_v6 = vld [vmem:[#allocation5 + $0x40] sm:$0xff]  ;;  %v1919_v7 = vpack.c.bf16 %v98_v4, %v90_v2  ;;  %v89_v9 = vld [vmem:[#allocation5 + $0x10] sm:$0xff]  ;;  %v104_v11 = vld [vmem:[#allocation5 + $0x88] sm:$0xff]  ;;  %s2569_s29 = scalar_lea.vmem %s1640_s28, 128  ;;  %p2574_p13 = scmp.lt.s32.totalorder %s1640_s28, %s1640_s28 }
  0x5e   :  { %v1793_v8 = vpack.c.bf16 %v95_v6, %v87_v5  ;;  %v97_v10 = vld [vmem:[#allocation5 + $0x50] sm:$0xff]  ;;  %v112_v13 = vld [vmem:[#allocation5 + $0xc8] sm:$0xff]  ;;  %v106_v14 = vld [vmem:[#allocation5 + $0x98] sm:$0xff]  ;;  %p2570_p12 = scmp.ne.s32.totalorder %s1640_s28, %s2569_s29  ;;  %p2575_p0 = scmp.lt.s32.totalorder %s2569_s29, %s2569_s29 }
  0x5f   :  { %1792 = vmatprep.subr.bf16.mxu0 %v1791_v3  ;;  %v1921_v12 = vpack.c.bf16 %v97_v10, %v89_v9  ;;  %v114_v15 = vld [vmem:[#allocation5 + $0xd8] sm:$0xff]  ;;  %1920 = vmatprep.subr.bf16.mxu1 %v1919_v7  ;;  %v1795_v16 = vpack.c.bf16 %v112_v13, %v104_v11  ;;  %v103_v18 = vld [vmem:[#allocation5 + $0x80] sm:$0xff]  ;;  %v105_v20 = vld [vmem:[#allocation5 + $0x90] sm:$0xff] }
  0x60   :  { %1794 = vmatpush1.bf16.msra.mxu0 %v1793_v8  ;;  %v1923_v17 = vpack.c.bf16 %v114_v15, %v106_v14  ;;  %v111_v19 = vld [vmem:[#allocation5 + $0xc0] sm:$0xff]  ;;  %v113_v22 = vld [vmem:[#allocation5 + $0xd0] sm:$0xff]  ;;  %v120_v23 = vld [vmem:[#allocation5 + $0x108] sm:$0xff]  ;;  %p2576_p1 = por %p2575_p0, %p2574_p13 }
  0x61   :  { %1922 = vmatpush1.bf16.msra.mxu1 %v1921_v12  ;;  %v1797_v21 = vpack.c.bf16 %v111_v19, %v103_v18  ;;  %v128_v24 = vld [vmem:[#allocation5 + $0x148] sm:$0xff]  ;;  %1796 = vmatprep.subr.bf16.mxu0 %v1795_v16  ;;  %v1925_v25 = vpack.c.bf16 %v113_v22, %v105_v20  ;;  %v122_v27 = vld [vmem:[#allocation5 + $0x118] sm:$0xff]  ;;  %v119_v29 = vld [vmem:[#allocation5 + $0x100] sm:$0xff] }
  0x62   :  { %1924 = vmatprep.subr.bf16.mxu1 %v1923_v17  ;;  %v1799_v26 = vpack.c.bf16 %v128_v24, %v120_v23  ;;  %v130_v28 = vld [vmem:[#allocation5 + $0x158] sm:$0xff]  ;;  %v127_v31 = vld [vmem:[#allocation5 + $0x140] sm:$0xff]  ;;  %v121_v32 = vld [vmem:[#allocation5 + $0x110] sm:$0xff]  ;;  %p2577_p2 = pnand %p2576_p1, %p2570_p12 }
  0x63   :  { %v1927_v30 = vpack.c.bf16 %v130_v28, %v122_v27  ;;  %v129_v33 = vld [vmem:[#allocation5 + $0x150] sm:$0xff]  ;;  %v1801_v34 = vpack.c.bf16 %v127_v31, %v119_v29  ;;  %v136_v35 = vld [vmem:[#allocation5 + $0x188] sm:$0xff]  ;;  %v138_v37 = vld [vmem:[#allocation5 + $0x198] sm:$0xff] }
  0x64   :  { %1798 = vmatpush1.bf16.msra.mxu0 %v1797_v21  ;;  %v144_v36 = vld [vmem:[#allocation5 + $0x1c8] sm:$0xff]  ;;  %v1929_v38 = vpack.c.bf16 %v129_v33, %v121_v32  ;;  %v146_v40 = vld [vmem:[#allocation5 + $0x1d8] sm:$0xff]  ;;  %v135_v41 = vld [vmem:[#allocation5 + $0x180] sm:$0xff] }
  0x65   :  { %1926 = vmatpush1.bf16.msra.mxu1 %v1925_v25  ;;  %1800 = vmatprep.subr.bf16.mxu0 %v1799_v26  ;;  %v1803_v39 = vpack.c.bf16 %v144_v36, %v136_v35  ;;  %v143_v42 = vld [vmem:[#allocation5 + $0x1c0] sm:$0xff]  ;;  %v1931_v43 = vpack.c.bf16 %v146_v40, %v138_v37  ;;  %v137_v44 = vld [vmem:[#allocation5 + $0x190] sm:$0xff]  ;;  %v152_v46 = vld [vmem:[#allocation5 + $0x208] sm:$0xff] }
  0x66   :  { %1928 = vmatprep.subr.bf16.mxu1 %v1927_v30  ;;  %v145_v45 = vld [vmem:[#allocation5 + $0x1d0] sm:$0xff]  ;;  %v160_v47 = vld [vmem:[#allocation5 + $0x248] sm:$0xff]  ;;  %v154_v48 = vld [vmem:[#allocation5 + $0x218] sm:$0xff]  ;;  %v1805_v50 = vpack.c.bf16 %v143_v42, %v135_v41 }
  0x67   :  { %v162_v49 = vld [vmem:[#allocation5 + $0x258] sm:$0xff]  ;;  %v1933_v51 = vpack.c.bf16 %v145_v45, %v137_v44  ;;  %v1807_v52 = vpack.c.bf16 %v160_v47, %v152_v46  ;;  %v151_v53 = vld [vmem:[#allocation5 + $0x200] sm:$0xff]  ;;  %v153_v55 = vld [vmem:[#allocation5 + $0x210] sm:$0xff] }
  0x68   :  { %1802 = vmatpush1.bf16.msra.mxu0 %v1801_v34  ;;  %v159_v54 = vld [vmem:[#allocation5 + $0x240] sm:$0xff]  ;;  %v1935_v56 = vpack.c.bf16 %v162_v49, %v154_v48  ;;  %v161_v57 = vld [vmem:[#allocation5 + $0x250] sm:$0xff]  ;;  %v168_v58 = vld [vmem:[#allocation5 + $0x288] sm:$0xff] }
  0x69   :  { %1930 = vmatpush1.bf16.msra.mxu1 %v1929_v38  ;;  %1804 = vmatprep.subr.bf16.mxu0 %v1803_v39  ;;  %v176_v59 = vld [vmem:[#allocation5 + $0x2c8] sm:$0xff]  ;;  %v170_v60 = vld [vmem:[#allocation5 + $0x298] sm:$0xff]  ;;  %v1809_v62 = vpack.c.bf16 %v159_v54, %v151_v53  ;;  %v1937_v63 = vpack.c.bf16 %v161_v57, %v153_v55  ;;  %v167_v1 = vld [vmem:[#allocation5 + $0x280] sm:$0xff] }
  0x6a   :  { %1932 = vmatprep.subr.bf16.mxu1 %v1931_v43  ;;  %v178_v61 = vld [vmem:[#allocation5 + $0x2d8] sm:$0xff]  ;;  %v1811_v0 = vpack.c.bf16 %v176_v59, %v168_v58  ;;  %v175_v2 = vld [vmem:[#allocation5 + $0x2c0] sm:$0xff]  ;;  %v169_v3 = vld [vmem:[#allocation5 + $0x290] sm:$0xff] }
  0x6b   :  { %v1939_v4 = vpack.c.bf16 %v178_v61, %v170_v60  ;;  %v177_v5 = vld [vmem:[#allocation5 + $0x2d0] sm:$0xff]  ;;  %v184_v6 = vld [vmem:[#allocation5 + $0x308] sm:$0xff]  ;;  %v186_v8 = vld [vmem:[#allocation5 + $0x318] sm:$0xff]  ;;  %v1813_v10 = vpack.c.bf16 %v175_v2, %v167_v1 }
  0x6c   :  { %1806 = vmatpush1.bf16.msra.mxu0 %v1805_v50  ;;  %v192_v7 = vld [vmem:[#allocation5 + $0x348] sm:$0xff]  ;;  %v194_v9 = vld [vmem:[#allocation5 + $0x358] sm:$0xff]  ;;  %v1941_v11 = vpack.c.bf16 %v177_v5, %v169_v3  ;;  %v183_v13 = vld [vmem:[#allocation5 + $0x300] sm:$0xff] }
  0x6d   :  { %1934 = vmatpush1.bf16.msra.mxu1 %v1933_v51  ;;  %1808 = vmatprep.subr.bf16.mxu0 %v1807_v52  ;;  %v1815_v12 = vpack.c.bf16 %v192_v7, %v184_v6  ;;  %v191_v14 = vld [vmem:[#allocation5 + $0x340] sm:$0xff]  ;;  %v185_v15 = vld [vmem:[#allocation5 + $0x310] sm:$0xff]  ;;  %v1943_v16 = vpack.c.bf16 %v194_v9, %v186_v8  ;;  %v200_v18 = vld [vmem:[#allocation5 + $0x388] sm:$0xff] }
  0x6e   :  { %1936 = vmatprep.subr.bf16.mxu1 %v1935_v56  ;;  %v193_v17 = vld [vmem:[#allocation5 + $0x350] sm:$0xff]  ;;  %v208_v19 = vld [vmem:[#allocation5 + $0x3c8] sm:$0xff]  ;;  %v202_v20 = vld [vmem:[#allocation5 + $0x398] sm:$0xff]  ;;  %v1817_v22 = vpack.c.bf16 %v191_v14, %v183_v13 }
  0x6f   :  { %v210_v21 = vld [vmem:[#allocation5 + $0x3d8] sm:$0xff]  ;;  %v1945_v23 = vpack.c.bf16 %v193_v17, %v185_v15  ;;  %v1819_v24 = vpack.c.bf16 %v208_v19, %v200_v18  ;;  %v199_v25 = vld [vmem:[#allocation5 + $0x380] sm:$0xff]  ;;  %v201_v27 = vld [vmem:[#allocation5 + $0x390] sm:$0xff] }
  0x70   :  { %1810 = vmatpush1.bf16.msra.mxu0 %v1809_v62  ;;  %v207_v26 = vld [vmem:[#allocation5 + $0x3c0] sm:$0xff]  ;;  %v1947_v28 = vpack.c.bf16 %v210_v21, %v202_v20  ;;  %v209_v29 = vld [vmem:[#allocation5 + $0x3d0] sm:$0xff]  ;;  %v216_v30 = vld [vmem:[#allocation5 + $0x408] sm:$0xff] }
  0x71   :  { %1938 = vmatpush1.bf16.msra.mxu1 %v1937_v63  ;;  %1812 = vmatprep.subr.bf16.mxu0 %v1811_v0  ;;  %v224_v31 = vld [vmem:[#allocation5 + $0x448] sm:$0xff]  ;;  %v218_v32 = vld [vmem:[#allocation5 + $0x418] sm:$0xff]  ;;  %v1821_v34 = vpack.c.bf16 %v207_v26, %v199_v25  ;;  %v1949_v35 = vpack.c.bf16 %v209_v29, %v201_v27  ;;  %v215_v37 = vld [vmem:[#allocation5 + $0x400] sm:$0xff] }
  0x72   :  { %1940 = vmatprep.subr.bf16.mxu1 %v1939_v4  ;;  %v226_v33 = vld [vmem:[#allocation5 + $0x458] sm:$0xff]  ;;  %v1823_v36 = vpack.c.bf16 %v224_v31, %v216_v30  ;;  %v223_v38 = vld [vmem:[#allocation5 + $0x440] sm:$0xff]  ;;  %v217_v39 = vld [vmem:[#allocation5 + $0x410] sm:$0xff] }
  0x73   :  { %v1951_v40 = vpack.c.bf16 %v226_v33, %v218_v32  ;;  %v225_v41 = vld [vmem:[#allocation5 + $0x450] sm:$0xff]  ;;  %v232_v42 = vld [vmem:[#allocation5 + $0x488] sm:$0xff]  ;;  %v234_v44 = vld [vmem:[#allocation5 + $0x498] sm:$0xff]  ;;  %v1825_v46 = vpack.c.bf16 %v223_v38, %v215_v37 }
  0x74   :  { %1814 = vmatpush1.bf16.msra.mxu0 %v1813_v10  ;;  %v240_v43 = vld [vmem:[#allocation5 + $0x4c8] sm:$0xff]  ;;  %v242_v45 = vld [vmem:[#allocation5 + $0x4d8] sm:$0xff]  ;;  %v1953_v47 = vpack.c.bf16 %v225_v41, %v217_v39  ;;  %v231_v49 = vld [vmem:[#allocation5 + $0x480] sm:$0xff] }
  0x75   :  { %1942 = vmatpush1.bf16.msra.mxu1 %v1941_v11  ;;  %1816 = vmatprep.subr.bf16.mxu0 %v1815_v12  ;;  %v1827_v48 = vpack.c.bf16 %v240_v43, %v232_v42  ;;  %v239_v50 = vld [vmem:[#allocation5 + $0x4c0] sm:$0xff]  ;;  %v233_v51 = vld [vmem:[#allocation5 + $0x490] sm:$0xff]  ;;  %v1955_v52 = vpack.c.bf16 %v242_v45, %v234_v44  ;;  %v248_v54 = vld [vmem:[#allocation5 + $0x508] sm:$0xff] }
  0x76   :  { %1944 = vmatprep.subr.bf16.mxu1 %v1943_v16  ;;  %v241_v53 = vld [vmem:[#allocation5 + $0x4d0] sm:$0xff]  ;;  %v256_v55 = vld [vmem:[#allocation5 + $0x548] sm:$0xff]  ;;  %v250_v56 = vld [vmem:[#allocation5 + $0x518] sm:$0xff]  ;;  %v1829_v58 = vpack.c.bf16 %v239_v50, %v231_v49 }
  0x77   :  { %v258_v57 = vld [vmem:[#allocation5 + $0x558] sm:$0xff]  ;;  %v1957_v59 = vpack.c.bf16 %v241_v53, %v233_v51  ;;  %v1831_v60 = vpack.c.bf16 %v256_v55, %v248_v54  ;;  %v247_v61 = vld [vmem:[#allocation5 + $0x500] sm:$0xff]  ;;  %v249_v63 = vld [vmem:[#allocation5 + $0x510] sm:$0xff] }
  0x78   :  { %1818 = vmatpush1.bf16.msra.mxu0 %v1817_v22  ;;  %v255_v62 = vld [vmem:[#allocation5 + $0x540] sm:$0xff]  ;;  %v1959_v0 = vpack.c.bf16 %v258_v57, %v250_v56  ;;  %v257_v1 = vld [vmem:[#allocation5 + $0x550] sm:$0xff]  ;;  %v264_v2 = vld [vmem:[#allocation5 + $0x588] sm:$0xff] }
  0x79   :  { %1946 = vmatpush1.bf16.msra.mxu1 %v1945_v23  ;;  %1820 = vmatprep.subr.bf16.mxu0 %v1819_v24  ;;  %v272_v3 = vld [vmem:[#allocation5 + $0x5c8] sm:$0xff]  ;;  %v266_v4 = vld [vmem:[#allocation5 + $0x598] sm:$0xff]  ;;  %v1833_v6 = vpack.c.bf16 %v255_v62, %v247_v61  ;;  %v263_v7 = vld [vmem:[#allocation5 + $0x580] sm:$0xff]  ;;  %v1961_v8 = vpack.c.bf16 %v257_v1, %v249_v63 }
  0x7a   :  { %1948 = vmatprep.subr.bf16.mxu1 %v1947_v28  ;;  %v274_v5 = vld [vmem:[#allocation5 + $0x5d8] sm:$0xff]  ;;  %v1835_v9 = vpack.c.bf16 %v272_v3, %v264_v2  ;;  %v271_v10 = vld [vmem:[#allocation5 + $0x5c0] sm:$0xff]  ;;  %v265_v11 = vld [vmem:[#allocation5 + $0x590] sm:$0xff] }
  0x7b   :  { %v273_v12 = vld [vmem:[#allocation5 + $0x5d0] sm:$0xff]  ;;  %v1963_v13 = vpack.c.bf16 %v274_v5, %v266_v4  ;;  %v280_v14 = vld [vmem:[#allocation5 + $0x608] sm:$0xff]  ;;  %v282_v17 = vld [vmem:[#allocation5 + $0x618] sm:$0xff]  ;;  %v1837_v19 = vpack.c.bf16 %v271_v10, %v263_v7 }
  0x7c   :  { %1822 = vmatpush1.bf16.msra.mxu0 %v1821_v34  ;;  %v288_v15 = vld [vmem:[#allocation5 + $0x648] sm:$0xff]  ;;  %v290_v18 = vld [vmem:[#allocation5 + $0x658] sm:$0xff]  ;;  %v1965_v20 = vpack.c.bf16 %v273_v12, %v265_v11  ;;  %v279_v22 = vld [vmem:[#allocation5 + $0x600] sm:$0xff] }
  0x7d   :  { %1950 = vmatpush1.bf16.msra.mxu1 %v1949_v35  ;;  %1824 = vmatprep.subr.bf16.mxu0 %v1823_v36  ;;  %v2699_v16 = vld [vmem:[#allocation2 + $0x8] sm:$0xff]  ;;  %v1839_v21 = vpack.c.bf16 %v288_v15, %v280_v14  ;;  %v287_v23 = vld [vmem:[#allocation5 + $0x640] sm:$0xff]  ;;  %v281_v24 = vld [vmem:[#allocation5 + $0x610] sm:$0xff]  ;;  %v1967_v25 = vpack.c.bf16 %v290_v18, %v282_v17 }
  0x7e   :  { %1952 = vmatprep.subr.bf16.mxu1 %v1951_v40  ;;  %705 = vmatprep.mubr.f32.mxu0 %v2699_v16  ;;  %v289_v26 = vld [vmem:[#allocation5 + $0x650] sm:$0xff]  ;;  %v296_v27 = vld [vmem:[#allocation5 + $0x688] sm:$0xff]  ;;  %v298_v29 = vld [vmem:[#allocation5 + $0x698] sm:$0xff]  ;;  %v1841_v31 = vpack.c.bf16 %v287_v23, %v279_v22 }
  0x7f   :  { %847 = vmatprep.mubr.f32.mxu1 %v2699_v16  ;;  %v304_v28 = vld [vmem:[#allocation5 + $0x6c8] sm:$0xff]  ;;  %v306_v30 = vld [vmem:[#allocation5 + $0x6d8] sm:$0xff]  ;;  %v1969_v32 = vpack.c.bf16 %v289_v26, %v281_v24  ;;  %v295_v34 = vld [vmem:[#allocation5 + $0x680] sm:$0xff] }
  0x80   :  { %1826 = vmatpush1.bf16.msra.mxu0 %v1825_v46  ;;  %v1843_v33 = vpack.c.bf16 %v304_v28, %v296_v27  ;;  %v303_v35 = vld [vmem:[#allocation5 + $0x6c0] sm:$0xff]  ;;  %v297_v36 = vld [vmem:[#allocation5 + $0x690] sm:$0xff]  ;;  %v1971_v37 = vpack.c.bf16 %v306_v30, %v298_v29  ;;  %v312_v39 = vld [vmem:[#allocation5 + $0x708] sm:$0xff] }
  0x81   :  { %1954 = vmatpush1.bf16.msra.mxu1 %v1953_v47  ;;  %1828 = vmatprep.subr.bf16.mxu0 %v1827_v48  ;;  %v305_v38 = vld [vmem:[#allocation5 + $0x6d0] sm:$0xff]  ;;  %v320_v40 = vld [vmem:[#allocation5 + $0x748] sm:$0xff]  ;;  %v314_v41 = vld [vmem:[#allocation5 + $0x718] sm:$0xff]  ;;  %v1845_v43 = vpack.c.bf16 %v303_v35, %v295_v34 }
  0x82   :  { %1956 = vmatprep.subr.bf16.mxu1 %v1955_v52  ;;  %v322_v42 = vld [vmem:[#allocation5 + $0x758] sm:$0xff]  ;;  %v1973_v44 = vpack.c.bf16 %v305_v38, %v297_v36  ;;  %v1847_v45 = vpack.c.bf16 %v320_v40, %v312_v39  ;;  %v311_v46 = vld [vmem:[#allocation5 + $0x700] sm:$0xff]  ;;  %v313_v48 = vld [vmem:[#allocation5 + $0x710] sm:$0xff] }
  0x83   :  { %v319_v47 = vld [vmem:[#allocation5 + $0x740] sm:$0xff]  ;;  %v1975_v49 = vpack.c.bf16 %v322_v42, %v314_v41  ;;  %v321_v50 = vld [vmem:[#allocation5 + $0x750] sm:$0xff]  ;;  %v328_v51 = vld [vmem:[#allocation5 + $0x788] sm:$0xff] }
  0x84   :  { %1830 = vmatpush1.bf16.msra.mxu0 %v1829_v58  ;;  %v336_v52 = vld [vmem:[#allocation5 + $0x7c8] sm:$0xff]  ;;  %v330_v53 = vld [vmem:[#allocation5 + $0x798] sm:$0xff]  ;;  %v1849_v55 = vpack.c.bf16 %v319_v47, %v311_v46  ;;  %v1977_v56 = vpack.c.bf16 %v321_v50, %v313_v48  ;;  %v327_v58 = vld [vmem:[#allocation5 + $0x780] sm:$0xff] }
  0x85   :  { %1958 = vmatpush1.bf16.msra.mxu1 %v1957_v59  ;;  %1832 = vmatprep.subr.bf16.mxu0 %v1831_v60  ;;  %v338_v54 = vld [vmem:[#allocation5 + $0x7d8] sm:$0xff]  ;;  %v1851_v57 = vpack.c.bf16 %v336_v52, %v328_v51  ;;  %v335_v59 = vld [vmem:[#allocation5 + $0x7c0] sm:$0xff]  ;;  %v329_v60 = vld [vmem:[#allocation5 + $0x790] sm:$0xff] }
  0x86   :  { %1960 = vmatprep.subr.bf16.mxu1 %v1959_v0  ;;  %v1979_v61 = vpack.c.bf16 %v338_v54, %v330_v53  ;;  %v337_v62 = vld [vmem:[#allocation5 + $0x7d0] sm:$0xff]  ;;  %v344_v63 = vld [vmem:[#allocation5 + $0x808] sm:$0xff]  ;;  %v346_v1 = vld [vmem:[#allocation5 + $0x818] sm:$0xff]  ;;  %v1853_v3 = vpack.c.bf16 %v335_v59, %v327_v58 }
  0x87   :  { %v352_v0 = vld [vmem:[#allocation5 + $0x848] sm:$0xff]  ;;  %v354_v2 = vld [vmem:[#allocation5 + $0x858] sm:$0xff]  ;;  %v1981_v4 = vpack.c.bf16 %v337_v62, %v329_v60  ;;  %v351_v7 = vld [vmem:[#allocation5 + $0x840] sm:$0xff] }
  0x88   :  { %1834 = vmatpush1.bf16.msra.mxu0 %v1833_v6  ;;  %v1855_v5 = vpack.c.bf16 %v352_v0, %v344_v63  ;;  %v343_v6 = vld [vmem:[#allocation5 + $0x800] sm:$0xff]  ;;  %v353_v10 = vld [vmem:[#allocation5 + $0x850] sm:$0xff]  ;;  %v360_v11 = vld [vmem:[#allocation5 + $0x888] sm:$0xff] }
  0x89   :  { %1962 = vmatpush1.bf16.msra.mxu1 %v1961_v8  ;;  %1836 = vmatprep.subr.bf16.mxu0 %v1835_v9  ;;  %v345_v8 = vld [vmem:[#allocation5 + $0x810] sm:$0xff]  ;;  %v1983_v9 = vpack.c.bf16 %v354_v2, %v346_v1  ;;  %v368_v12 = vld [vmem:[#allocation5 + $0x8c8] sm:$0xff]  ;;  %v370_v14 = vld [vmem:[#allocation5 + $0x8d8] sm:$0xff]  ;;  %v1857_v17 = vpack.c.bf16 %v351_v7, %v343_v6 }
  0x8a   :  { %1964 = vmatprep.subr.bf16.mxu1 %v1963_v13  ;;  %v362_v13 = vld [vmem:[#allocation5 + $0x898] sm:$0xff]  ;;  %v83_v15 = vld [vmem:[#allocation2] sm:$0xff]  ;;  %v1985_v18 = vpack.c.bf16 %v353_v10, %v345_v8  ;;  %v361_v22 = vld [vmem:[#allocation5 + $0x890] sm:$0xff] }
  0x8b   :  { %v1987_v23 = vpack.c.bf16 %v370_v14, %v362_v13  ;;  %v369_v24 = vld [vmem:[#allocation5 + $0x8d0] sm:$0xff]  ;;  %v384_v26 = vld [vmem:[#allocation5 + $0x948] sm:$0xff]  ;;  %v378_v27 = vld [vmem:[#allocation5 + $0x918] sm:$0xff] }
  0x8c   :  { %1838 = vmatpush1.bf16.msra.mxu0 %v1837_v19  ;;  %v1859_v19 = vpack.c.bf16 %v368_v12, %v360_v11  ;;  %v386_v28 = vld [vmem:[#allocation5 + $0x958] sm:$0xff]  ;;  %v1989_v30 = vpack.c.bf16 %v369_v24, %v361_v22  ;;  %v377_v34 = vld [vmem:[#allocation5 + $0x910] sm:$0xff]  ;;  %v400_v38 = vld [vmem:[#allocation5 + $0x9c8] sm:$0xff] }
  0x8d   :  { %1966 = vmatpush1.bf16.msra.mxu1 %v1965_v20  ;;  %1840 = vmatprep.subr.bf16.mxu0 %v1839_v21  ;;  %v359_v20 = vld [vmem:[#allocation5 + $0x880] sm:$0xff]  ;;  %v1991_v35 = vpack.c.bf16 %v386_v28, %v378_v27  ;;  %v385_v36 = vld [vmem:[#allocation5 + $0x950] sm:$0xff]  ;;  %v394_v39 = vld [vmem:[#allocation5 + $0x998] sm:$0xff] }
  0x8e   :  { %1968 = vmatprep.subr.bf16.mxu1 %v1967_v25  ;;  %v367_v21 = vld [vmem:[#allocation5 + $0x8c0] sm:$0xff]  ;;  %v376_v25 = vld [vmem:[#allocation5 + $0x908] sm:$0xff]  ;;  %v402_v40 = vld [vmem:[#allocation5 + $0x9d8] sm:$0xff]  ;;  %v1993_v42 = vpack.c.bf16 %v385_v36, %v377_v34 }
  0x8f   :  { %v1861_v29 = vpack.c.bf16 %v367_v21, %v359_v20  ;;  %v393_v46 = vld [vmem:[#allocation5 + $0x990] sm:$0xff]  ;;  %v1995_v47 = vpack.c.bf16 %v402_v40, %v394_v39  ;;  %v416_v50 = vld [vmem:[#allocation5 + $0xa48] sm:$0xff]  ;;  %v410_v51 = vld [vmem:[#allocation5 + $0xa18] sm:$0xff] }
  0x90   :  { %1842 = vmatpush1.bf16.msra.mxu0 %v1841_v31  ;;  %v1863_v31 = vpack.c.bf16 %v384_v26, %v376_v25  ;;  %v401_v48 = vld [vmem:[#allocation5 + $0x9d0] sm:$0xff]  ;;  %v418_v52 = vld [vmem:[#allocation5 + $0xa58] sm:$0xff]  ;;  %v432_v62 = vld [vmem:[#allocation5 + $0xac8] sm:$0xff] }
  0x91   :  { %1970 = vmatpush1.bf16.msra.mxu1 %v1969_v32  ;;  %1844 = vmatprep.subr.bf16.mxu0 %v1843_v33  ;;  %v375_v32 = vld [vmem:[#allocation5 + $0x900] sm:$0xff]  ;;  %v1997_v54 = vpack.c.bf16 %v401_v48, %v393_v46  ;;  %v409_v58 = vld [vmem:[#allocation5 + $0xa10] sm:$0xff]  ;;  %v1999_v59 = vpack.c.bf16 %v418_v52, %v410_v51  ;;  %v426_v63 = vld [vmem:[#allocation5 + $0xa98] sm:$0xff] }
  0x92   :  { %1972 = vmatprep.subr.bf16.mxu1 %v1971_v37  ;;  %v383_v33 = vld [vmem:[#allocation5 + $0x940] sm:$0xff]  ;;  %v392_v37 = vld [vmem:[#allocation5 + $0x988] sm:$0xff]  ;;  %v417_v60 = vld [vmem:[#allocation5 + $0xa50] sm:$0xff] }
  0x93   :  { %v1865_v41 = vpack.c.bf16 %v383_v33, %v375_v32  ;;  %v434_v0 = vld [vmem:[#allocation5 + $0xad8] sm:$0xff]  ;;  %v2001_v2 = vpack.c.bf16 %v417_v60, %v409_v58  ;;  %v425_v6 = vld [vmem:[#allocation5 + $0xa90] sm:$0xff]  ;;  %v448_v10 = vld [vmem:[#allocation5 + $0xb48] sm:$0xff] }
  0x94   :  { %1846 = vmatpush1.bf16.msra.mxu0 %v1845_v43  ;;  %v1867_v43 = vpack.c.bf16 %v400_v38, %v392_v37  ;;  %v2003_v7 = vpack.c.bf16 %v434_v0, %v426_v63  ;;  %v433_v8 = vld [vmem:[#allocation5 + $0xad0] sm:$0xff]  ;;  %v442_v11 = vld [vmem:[#allocation5 + $0xb18] sm:$0xff]  ;;  %v439_v14 = vld [vmem:[#allocation5 + $0xb00] sm:$0xff] }
  0x95   :  { %1974 = vmatpush1.bf16.msra.mxu1 %v1973_v44  ;;  %1848 = vmatprep.subr.bf16.mxu0 %v1847_v45  ;;  %v391_v44 = vld [vmem:[#allocation5 + $0x980] sm:$0xff]  ;;  %v450_v12 = vld [vmem:[#allocation5 + $0xb58] sm:$0xff]  ;;  %v449_v20 = vld [vmem:[#allocation5 + $0xb50] sm:$0xff] }
  0x96   :  { %1976 = vmatprep.subr.bf16.mxu1 %v1975_v49  ;;  %v399_v45 = vld [vmem:[#allocation5 + $0x9c0] sm:$0xff]  ;;  %v408_v49 = vld [vmem:[#allocation5 + $0xa08] sm:$0xff]  ;;  %v2007_v21 = vpack.c.bf16 %v450_v12, %v442_v11  ;;  %v2703_v24 = vld [vmem:[#allocation2 + $0x18] sm:$0xff] }
  0x97   :  { %v1869_v53 = vpack.c.bf16 %v399_v45, %v391_v44  ;;  %v456_v22 = vld [vmem:[#allocation5 + $0xb88] sm:$0xff]  ;;  %v458_v25 = vld [vmem:[#allocation5 + $0xb98] sm:$0xff]  ;;  %v457_v32 = vld [vmem:[#allocation5 + $0xb90] sm:$0xff] }
  0x98   :  { %1850 = vmatpush1.bf16.msra.mxu0 %v1849_v55  ;;  %v1871_v55 = vpack.c.bf16 %v416_v50, %v408_v49  ;;  %v466_v26 = vld [vmem:[#allocation5 + $0xbd8] sm:$0xff]  ;;  %v465_v34 = vld [vmem:[#allocation5 + $0xbd0] sm:$0xff]  ;;  %v480_v36 = vld [vmem:[#allocation5 + $0xc48] sm:$0xff] }
  0x99   :  { %1978 = vmatpush1.bf16.msra.mxu1 %v1977_v56  ;;  %1852 = vmatprep.subr.bf16.mxu0 %v1851_v57  ;;  %v407_v56 = vld [vmem:[#allocation5 + $0xa00] sm:$0xff]  ;;  %v2011_v33 = vpack.c.bf16 %v466_v26, %v458_v25  ;;  %v474_v37 = vld [vmem:[#allocation5 + $0xc18] sm:$0xff]  ;;  %v2013_v40 = vpack.c.bf16 %v465_v34, %v457_v32  ;;  %v473_v44 = vld [vmem:[#allocation5 + $0xc10] sm:$0xff] }
  0x9a   :  { %1980 = vmatprep.subr.bf16.mxu1 %v1979_v61  ;;  %v415_v57 = vld [vmem:[#allocation5 + $0xa40] sm:$0xff]  ;;  %v424_v61 = vld [vmem:[#allocation5 + $0xa88] sm:$0xff]  ;;  %v482_v38 = vld [vmem:[#allocation5 + $0xc58] sm:$0xff] }
  0x9b   :  { %v1873_v1 = vpack.c.bf16 %v415_v57, %v407_v56  ;;  %v2015_v45 = vpack.c.bf16 %v482_v38, %v474_v37  ;;  %v481_v46 = vld [vmem:[#allocation5 + $0xc50] sm:$0xff]  ;;  %v496_v48 = vld [vmem:[#allocation5 + $0xcc8] sm:$0xff]  ;;  %v490_v49 = vld [vmem:[#allocation5 + $0xc98] sm:$0xff] }
  0x9c   :  { %1854 = vmatpush1.bf16.msra.mxu0 %v1853_v3  ;;  %v1875_v3 = vpack.c.bf16 %v432_v62, %v424_v61  ;;  %v498_v50 = vld [vmem:[#allocation5 + $0xcd8] sm:$0xff]  ;;  %v2017_v52 = vpack.c.bf16 %v481_v46, %v473_v44  ;;  %v489_v56 = vld [vmem:[#allocation5 + $0xc90] sm:$0xff]  ;;  %v512_v60 = vld [vmem:[#allocation5 + $0xd48] sm:$0xff] }
  0x9d   :  { %1982 = vmatpush1.bf16.msra.mxu1 %v1981_v4  ;;  %1856 = vmatprep.subr.bf16.mxu0 %v1855_v5  ;;  %v423_v4 = vld [vmem:[#allocation5 + $0xa80] sm:$0xff]  ;;  %v2019_v57 = vpack.c.bf16 %v498_v50, %v490_v49  ;;  %v497_v58 = vld [vmem:[#allocation5 + $0xcd0] sm:$0xff]  ;;  %v506_v61 = vld [vmem:[#allocation5 + $0xd18] sm:$0xff] }
  0x9e   :  { %1984 = vmatprep.subr.bf16.mxu1 %v1983_v9  ;;  %v431_v5 = vld [vmem:[#allocation5 + $0xac0] sm:$0xff]  ;;  %v440_v9 = vld [vmem:[#allocation5 + $0xb08] sm:$0xff]  ;;  %v514_v62 = vld [vmem:[#allocation5 + $0xd58] sm:$0xff]  ;;  %v2021_v0 = vpack.c.bf16 %v497_v58, %v489_v56 }
  0x9f   :  { %706 = vmatmul.mubr.f32.vlgmr.msra.gmra.mrb[0].mxu0 %v83_v15  ;;  %v1877_v13 = vpack.c.bf16 %v431_v5, %v423_v4  ;;  %v505_v4 = vld [vmem:[#allocation5 + $0xd10] sm:$0xff]  ;;  %v2023_v5 = vpack.c.bf16 %v514_v62, %v506_v61  ;;  %v560_v34 = vld [vmem:[#allocation5 + $0xec8] sm:$0xff] }
  0xa0   :  { %1858 = vmatpush1.bf16.msra.mxu0 %v1857_v17  ;;  %848 = vmatmul.mubr.f32.vlgmr.msra.gmra.mrb[0].mxu1 %v83_v15  ;;  %v2005_v15 = vpack.c.bf16 %v433_v8, %v425_v6  ;;  %v1879_v17 = vpack.c.bf16 %v448_v10, %v440_v9  ;;  %v513_v6 = vld [vmem:[#allocation5 + $0xd50] sm:$0xff]  ;;  %v528_v8 = vld [vmem:[#allocation5 + $0xdc8] sm:$0xff]  ;;  %v522_v9 = vld [vmem:[#allocation5 + $0xd98] sm:$0xff] }
  0xa1   :  { %1986 = vmatpush1.bf16.msra.mxu1 %v1985_v18  ;;  %1860 = vmatprep.subr.bf16.mxu0 %v1859_v19  ;;  %v447_v18 = vld [vmem:[#allocation5 + $0xb40] sm:$0xff]  ;;  %v441_v19 = vld [vmem:[#allocation5 + $0xb10] sm:$0xff]  ;;  %v530_v10 = vld [vmem:[#allocation5 + $0xdd8] sm:$0xff]  ;;  %v2025_v12 = vpack.c.bf16 %v513_v6, %v505_v4 }
  0xa2   :  { %1988 = vmatprep.subr.bf16.mxu1 %v1987_v23  ;;  %v464_v23 = vld [vmem:[#allocation5 + $0xbc8] sm:$0xff]  ;;  %776 = vmatprep.mubr.f32.mxu0 %v2703_v24  ;;  %v1881_v27 = vpack.c.bf16 %v447_v18, %v439_v14  ;;  %v2009_v28 = vpack.c.bf16 %v449_v20, %v441_v19  ;;  %v519_v14 = vld [vmem:[#allocation5 + $0xd80] sm:$0xff]  ;;  %v2027_v18 = vpack.c.bf16 %v530_v10, %v522_v9  ;;  %v529_v19 = vld [vmem:[#allocation5 + $0xdd0] sm:$0xff] }
  0xa3   :  { %918 = vmatprep.mubr.f32.mxu1 %v2703_v24  ;;  %v536_v20 = vld [vmem:[#allocation5 + $0xe08] sm:$0xff]  ;;  %v545_v32 = vld [vmem:[#allocation5 + $0xe50] sm:$0xff] }
  0xa4   :  { %1862 = vmatpush1.bf16.msra.mxu0 %v1861_v29  ;;  %v1883_v29 = vpack.c.bf16 %v464_v23, %v456_v22  ;;  %v538_v22 = vld [vmem:[#allocation5 + $0xe18] sm:$0xff]  ;;  %v561_v44 = vld [vmem:[#allocation5 + $0xed0] sm:$0xff]  ;;  %v576_v46 = vld [vmem:[#allocation5 + $0xf48] sm:$0xff] }
  0xa5   :  { %1990 = vmatpush1.bf16.msra.mxu1 %v1989_v30  ;;  %1864 = vmatprep.subr.bf16.mxu0 %v1863_v31  ;;  %v455_v30 = vld [vmem:[#allocation5 + $0xb80] sm:$0xff]  ;;  %v546_v23 = vld [vmem:[#allocation5 + $0xe58] sm:$0xff]  ;;  %v577_v56 = vld [vmem:[#allocation5 + $0xf50] sm:$0xff] }
  0xa6   :  { %1992 = vmatprep.subr.bf16.mxu1 %v1991_v35  ;;  %v463_v31 = vld [vmem:[#allocation5 + $0xbc0] sm:$0xff]  ;;  %v472_v35 = vld [vmem:[#allocation5 + $0xc08] sm:$0xff]  ;;  %v593_v4 = vld [vmem:[#allocation5 + $0xfd0] sm:$0xff] }
  0xa7   :  { %v1885_v39 = vpack.c.bf16 %v463_v31, %v455_v30  ;;  %v537_v30 = vld [vmem:[#allocation5 + $0xe10] sm:$0xff]  ;;  %v2031_v31 = vpack.c.bf16 %v546_v23, %v538_v22  ;;  %v592_v58 = vld [vmem:[#allocation5 + $0xfc8] sm:$0xff] }
  0xa8   :  { %1866 = vmatpush1.bf16.msra.mxu0 %v1865_v41  ;;  %v1887_v41 = vpack.c.bf16 %v480_v36, %v472_v35  ;;  %v554_v35 = vld [vmem:[#allocation5 + $0xe98] sm:$0xff]  ;;  %v2033_v38 = vpack.c.bf16 %v545_v32, %v537_v30  ;;  %v100_v6 = vld [vmem:[#allocation5 + $0x68] sm:$0xff]  ;;  %v85_v22 = vld [vmem:[#allocation2 + $0x10] sm:$0xff] }
  0xa9   :  { %1994 = vmatpush1.bf16.msra.mxu1 %v1993_v42  ;;  %1868 = vmatprep.subr.bf16.mxu0 %v1867_v43  ;;  %v471_v42 = vld [vmem:[#allocation5 + $0xc00] sm:$0xff]  ;;  %v562_v36 = vld [vmem:[#allocation5 + $0xed8] sm:$0xff]  ;;  %v124_v32 = vld [vmem:[#allocation5 + $0x128] sm:$0xff] }
  0xaa   :  { %1996 = vmatprep.subr.bf16.mxu1 %v1995_v47  ;;  %v479_v43 = vld [vmem:[#allocation5 + $0xc40] sm:$0xff]  ;;  %v488_v47 = vld [vmem:[#allocation5 + $0xc88] sm:$0xff] }
  0xab   :  { %v1889_v51 = vpack.c.bf16 %v479_v43, %v471_v42  ;;  %v553_v42 = vld [vmem:[#allocation5 + $0xe90] sm:$0xff]  ;;  %v2035_v43 = vpack.c.bf16 %v562_v36, %v554_v35  ;;  %v134_v35 = vld [vmem:[#allocation5 + $0x178] sm:$0xff] }
  0xac   :  { %1870 = vmatpush1.bf16.msra.mxu0 %v1869_v53  ;;  %v1891_v53 = vpack.c.bf16 %v496_v48, %v488_v47  ;;  %v570_v47 = vld [vmem:[#allocation5 + $0xf18] sm:$0xff]  ;;  %v2037_v50 = vpack.c.bf16 %v561_v44, %v553_v42  ;;  %v140_v44 = vld [vmem:[#allocation5 + $0x1a8] sm:$0xff] }
  0xad   :  { %1998 = vmatpush1.bf16.msra.mxu1 %v1997_v54  ;;  %1872 = vmatprep.subr.bf16.mxu0 %v1871_v55  ;;  %v487_v54 = vld [vmem:[#allocation5 + $0xc80] sm:$0xff]  ;;  %v578_v48 = vld [vmem:[#allocation5 + $0xf58] sm:$0xff] }
  0xae   :  { %2000 = vmatprep.subr.bf16.mxu1 %v1999_v59  ;;  %v495_v55 = vld [vmem:[#allocation5 + $0xcc0] sm:$0xff]  ;;  %v504_v59 = vld [vmem:[#allocation5 + $0xd08] sm:$0xff] }
  0xaf   :  { %v1893_v63 = vpack.c.bf16 %v495_v55, %v487_v54  ;;  %v569_v54 = vld [vmem:[#allocation5 + $0xf10] sm:$0xff]  ;;  %v2039_v55 = vpack.c.bf16 %v578_v48, %v570_v47  ;;  %v150_v47 = vld [vmem:[#allocation5 + $0x1f8] sm:$0xff] }
  0xb0   :  { %1874 = vmatpush1.bf16.msra.mxu0 %v1873_v1  ;;  %v1895_v1 = vpack.c.bf16 %v512_v60, %v504_v59  ;;  %v586_v59 = vld [vmem:[#allocation5 + $0xf98] sm:$0xff]  ;;  %v2041_v62 = vpack.c.bf16 %v577_v56, %v569_v54  ;;  %v156_v56 = vld [vmem:[#allocation5 + $0x228] sm:$0xff] }
  0xb1   :  { %2002 = vmatpush1.bf16.msra.mxu1 %v2001_v2  ;;  %1876 = vmatprep.subr.bf16.mxu0 %v1875_v3  ;;  %v503_v2 = vld [vmem:[#allocation5 + $0xd00] sm:$0xff]  ;;  %v594_v60 = vld [vmem:[#allocation5 + $0xfd8] sm:$0xff] }
  0xb2   :  { %2004 = vmatprep.subr.bf16.mxu1 %v2003_v7  ;;  %v511_v3 = vld [vmem:[#allocation5 + $0xd40] sm:$0xff]  ;;  %v520_v7 = vld [vmem:[#allocation5 + $0xd88] sm:$0xff] }
  0xb3   :  { %v1897_v11 = vpack.c.bf16 %v511_v3, %v503_v2  ;;  %v585_v2 = vld [vmem:[#allocation5 + $0xf90] sm:$0xff]  ;;  %v2043_v3 = vpack.c.bf16 %v594_v60, %v586_v59  ;;  %v166_v59 = vld [vmem:[#allocation5 + $0x278] sm:$0xff] }
  0xb4   :  { %1878 = vmatpush1.bf16.msra.mxu0 %v1877_v13  ;;  %v1899_v13 = vpack.c.bf16 %v528_v8, %v520_v7  ;;  %v94_v7 = vld [vmem:[#allocation5 + $0x38] sm:$0xff]  ;;  %v2045_v10 = vpack.c.bf16 %v593_v4, %v585_v2  ;;  %v165_v2 = vld [vmem:[#allocation5 + $0x270] sm:$0xff]  ;;  %v180_v4 = vld [vmem:[#allocation5 + $0x2e8] sm:$0xff] }
  0xb5   :  { %2006 = vmatpush1.bf16.msra.mxu1 %v2005_v15  ;;  %1880 = vmatprep.subr.bf16.mxu0 %v1879_v17  ;;  %v527_v15 = vld [vmem:[#allocation5 + $0xdc0] sm:$0xff]  ;;  %v521_v17 = vld [vmem:[#allocation5 + $0xd90] sm:$0xff]  ;;  %v102_v8 = vld [vmem:[#allocation5 + $0x78] sm:$0xff] }
  0xb6   :  { %2008 = vmatprep.subr.bf16.mxu1 %v2007_v21  ;;  %v544_v21 = vld [vmem:[#allocation5 + $0xe48] sm:$0xff]  ;;  %v1901_v25 = vpack.c.bf16 %v527_v15, %v519_v14  ;;  %v2029_v26 = vpack.c.bf16 %v529_v19, %v521_v17  ;;  %v93_v14 = vld [vmem:[#allocation5 + $0x30] sm:$0xff]  ;;  %v2175_v15 = vpack.c.bf16 %v102_v8, %v94_v7 }
  0xb7   :  { %v101_v17 = vld [vmem:[#allocation5 + $0x70] sm:$0xff]  ;;  %v116_v19 = vld [vmem:[#allocation5 + $0xe8] sm:$0xff] }
  0xb8   :  { %1882 = vmatpush1.bf16.msra.mxu0 %v1881_v27  ;;  %v1903_v27 = vpack.c.bf16 %v544_v21, %v536_v20  ;;  %v110_v20 = vld [vmem:[#allocation5 + $0xb8] sm:$0xff] }
  0xb9   :  { %2010 = vmatpush1.bf16.msra.mxu1 %v2009_v28  ;;  %1884 = vmatprep.subr.bf16.mxu0 %v1883_v29  ;;  %v535_v28 = vld [vmem:[#allocation5 + $0xe00] sm:$0xff]  ;;  %v118_v21 = vld [vmem:[#allocation5 + $0xf8] sm:$0xff] }
  0xba   :  { %2012 = vmatprep.subr.bf16.mxu1 %v2011_v33  ;;  %v543_v29 = vld [vmem:[#allocation5 + $0xe40] sm:$0xff]  ;;  %v552_v33 = vld [vmem:[#allocation5 + $0xe88] sm:$0xff]  ;;  %v2179_v30 = vpack.c.bf16 %v118_v21, %v110_v20 }
  0xbb   :  { %v1905_v37 = vpack.c.bf16 %v543_v29, %v535_v28  ;;  %v115_v28 = vld [vmem:[#allocation5 + $0xe0] sm:$0xff]  ;;  %v109_v29 = vld [vmem:[#allocation5 + $0xb0] sm:$0xff] }
  0xbc   :  { %1886 = vmatpush1.bf16.msra.mxu0 %v1885_v39  ;;  %v1907_v39 = vpack.c.bf16 %v560_v34, %v552_v33  ;;  %v132_v33 = vld [vmem:[#allocation5 + $0x168] sm:$0xff]  ;;  %v126_v34 = vld [vmem:[#allocation5 + $0x138] sm:$0xff] }
  0xbd   :  { %2014 = vmatpush1.bf16.msra.mxu1 %v2013_v40  ;;  %1888 = vmatprep.subr.bf16.mxu0 %v1887_v41  ;;  %v551_v40 = vld [vmem:[#allocation5 + $0xe80] sm:$0xff]  ;;  %v2183_v42 = vpack.c.bf16 %v134_v35, %v126_v34 }
  0xbe   :  { %2016 = vmatprep.subr.bf16.mxu1 %v2015_v45  ;;  %v559_v41 = vld [vmem:[#allocation5 + $0xec0] sm:$0xff]  ;;  %v568_v45 = vld [vmem:[#allocation5 + $0xf08] sm:$0xff] }
  0xbf   :  { %v1909_v49 = vpack.c.bf16 %v559_v41, %v551_v40  ;;  %v131_v40 = vld [vmem:[#allocation5 + $0x160] sm:$0xff]  ;;  %v125_v41 = vld [vmem:[#allocation5 + $0x130] sm:$0xff] }
  0xc0   :  { %1890 = vmatpush1.bf16.msra.mxu0 %v1889_v51  ;;  %v1911_v51 = vpack.c.bf16 %v576_v46, %v568_v45  ;;  %v148_v45 = vld [vmem:[#allocation5 + $0x1e8] sm:$0xff]  ;;  %v142_v46 = vld [vmem:[#allocation5 + $0x1b8] sm:$0xff] }
  0xc1   :  { %2018 = vmatpush1.bf16.msra.mxu1 %v2017_v52  ;;  %1892 = vmatprep.subr.bf16.mxu0 %v1891_v53  ;;  %v567_v52 = vld [vmem:[#allocation5 + $0xf00] sm:$0xff]  ;;  %v2187_v54 = vpack.c.bf16 %v150_v47, %v142_v46 }
  0xc2   :  { %2020 = vmatprep.subr.bf16.mxu1 %v2019_v57  ;;  %v575_v53 = vld [vmem:[#allocation5 + $0xf40] sm:$0xff]  ;;  %v584_v57 = vld [vmem:[#allocation5 + $0xf88] sm:$0xff] }
  0xc3   :  { %v1913_v61 = vpack.c.bf16 %v575_v53, %v567_v52  ;;  %v147_v52 = vld [vmem:[#allocation5 + $0x1e0] sm:$0xff]  ;;  %v141_v53 = vld [vmem:[#allocation5 + $0x1b0] sm:$0xff] }
  0xc4   :  { %1894 = vmatpush1.bf16.msra.mxu0 %v1893_v63  ;;  %v1915_v63 = vpack.c.bf16 %v592_v58, %v584_v57  ;;  %v164_v57 = vld [vmem:[#allocation5 + $0x268] sm:$0xff]  ;;  %v158_v58 = vld [vmem:[#allocation5 + $0x238] sm:$0xff] }
  0xc5   :  { %2022 = vmatpush1.bf16.msra.mxu1 %v2021_v0  ;;  %1896 = vmatprep.subr.bf16.mxu0 %v1895_v1  ;;  %v583_v0 = vld [vmem:[#allocation5 + $0xf80] sm:$0xff] }
  0xc6   :  { %2024 = vmatprep.subr.bf16.mxu1 %v2023_v5  ;;  %v591_v1 = vld [vmem:[#allocation5 + $0xfc0] sm:$0xff]  ;;  %v92_v5 = vld [vmem:[#allocation5 + $0x28] sm:$0xff] }
  0xc7   :  { %v1917_v9 = vpack.c.bf16 %v591_v1, %v583_v0  ;;  %v157_v0 = vld [vmem:[#allocation5 + $0x230] sm:$0xff]  ;;  %v2191_v1 = vpack.c.bf16 %v166_v59, %v158_v58 }
  0xc8   :  { %1898 = vmatpush1.bf16.msra.mxu0 %v1897_v11  ;;  %v2047_v11 = vpack.c.bf16 %v100_v6, %v92_v5  ;;  %v174_v5 = vld [vmem:[#allocation5 + $0x2b8] sm:$0xff]  ;;  %v2193_v8 = vpack.c.bf16 %v165_v2, %v157_v0  ;;  %v252_v0 = vld [vmem:[#allocation5 + $0x528] sm:$0xff] }
  0xc9   :  { %2026 = vmatpush1.bf16.msra.mxu1 %v2025_v12  ;;  %1900 = vmatprep.subr.bf16.mxu0 %v1899_v13  ;;  %v91_v12 = vld [vmem:[#allocation5 + $0x20] sm:$0xff]  ;;  %v182_v6 = vld [vmem:[#allocation5 + $0x2f8] sm:$0xff] }
  0xca   :  { %2028 = vmatprep.subr.bf16.mxu1 %v2027_v18  ;;  %v99_v13 = vld [vmem:[#allocation5 + $0x60] sm:$0xff]  ;;  %v108_v18 = vld [vmem:[#allocation5 + $0xa8] sm:$0xff]  ;;  %v254_v2 = vld [vmem:[#allocation5 + $0x538] sm:$0xff] }
  0xcb   :  { %v2049_v23 = vpack.c.bf16 %v99_v13, %v91_v12  ;;  %v173_v12 = vld [vmem:[#allocation5 + $0x2b0] sm:$0xff]  ;;  %v2195_v13 = vpack.c.bf16 %v182_v6, %v174_v5 }
  0xcc   :  { %1902 = vmatpush1.bf16.msra.mxu0 %v1901_v25  ;;  %v2177_v25 = vpack.c.bf16 %v101_v17, %v93_v14  ;;  %v181_v14 = vld [vmem:[#allocation5 + $0x2f0] sm:$0xff]  ;;  %v196_v17 = vld [vmem:[#allocation5 + $0x368] sm:$0xff] }
  0xcd   :  { %2030 = vmatpush1.bf16.msra.mxu1 %v2029_v26  ;;  %1904 = vmatprep.subr.bf16.mxu0 %v1903_v27  ;;  %v2051_v26 = vpack.c.bf16 %v116_v19, %v108_v18  ;;  %v107_v27 = vld [vmem:[#allocation5 + $0xa0] sm:$0xff]  ;;  %v190_v18 = vld [vmem:[#allocation5 + $0x338] sm:$0xff]  ;;  %v2197_v21 = vpack.c.bf16 %v181_v14, %v173_v12  ;;  %v268_v12 = vld [vmem:[#allocation5 + $0x5a8] sm:$0xff] }
  0xce   :  { %2032 = vmatprep.subr.bf16.mxu1 %v2031_v31  ;;  %v117_v31 = vld [vmem:[#allocation5 + $0xf0] sm:$0xff]  ;;  %v2053_v36 = vpack.c.bf16 %v115_v28, %v107_v27  ;;  %v198_v19 = vld [vmem:[#allocation5 + $0x378] sm:$0xff] }
  0xcf   :  { %v2199_v27 = vpack.c.bf16 %v198_v19, %v190_v18  ;;  %v197_v28 = vld [vmem:[#allocation5 + $0x370] sm:$0xff]  ;;  %v270_v14 = vld [vmem:[#allocation5 + $0x5b8] sm:$0xff] }
  0xd0   :  { %1906 = vmatpush1.bf16.msra.mxu0 %v1905_v37  ;;  %v2181_v37 = vpack.c.bf16 %v117_v31, %v109_v29  ;;  %v204_v29 = vld [vmem:[#allocation5 + $0x3a8] sm:$0xff]  ;;  %v206_v31 = vld [vmem:[#allocation5 + $0x3b8] sm:$0xff] }
  0xd1   :  { %2034 = vmatpush1.bf16.msra.mxu1 %v2033_v38  ;;  %1908 = vmatprep.subr.bf16.mxu0 %v1907_v39  ;;  %v2055_v38 = vpack.c.bf16 %v132_v33, %v124_v32  ;;  %v123_v39 = vld [vmem:[#allocation5 + $0x120] sm:$0xff]  ;;  %v214_v32 = vld [vmem:[#allocation5 + $0x3f8] sm:$0xff] }
  0xd2   :  { %2036 = vmatprep.subr.bf16.mxu1 %v2035_v43  ;;  %v133_v43 = vld [vmem:[#allocation5 + $0x170] sm:$0xff]  ;;  %v2057_v48 = vpack.c.bf16 %v131_v40, %v123_v39  ;;  %v2203_v39 = vpack.c.bf16 %v214_v32, %v206_v31 }
  0xd3   :  { %v213_v40 = vld [vmem:[#allocation5 + $0x3f0] sm:$0xff] }
  0xd4   :  { %1910 = vmatpush1.bf16.msra.mxu0 %v1909_v49  ;;  %v2185_v49 = vpack.c.bf16 %v133_v43, %v125_v41  ;;  %v220_v41 = vld [vmem:[#allocation5 + $0x428] sm:$0xff]  ;;  %v222_v43 = vld [vmem:[#allocation5 + $0x438] sm:$0xff] }
  0xd5   :  { %2038 = vmatpush1.bf16.msra.mxu1 %v2037_v50  ;;  %1912 = vmatprep.subr.bf16.mxu0 %v1911_v51  ;;  %v2059_v50 = vpack.c.bf16 %v148_v45, %v140_v44  ;;  %v139_v51 = vld [vmem:[#allocation5 + $0x1a0] sm:$0xff]  ;;  %v230_v44 = vld [vmem:[#allocation5 + $0x478] sm:$0xff] }
  0xd6   :  { %2040 = vmatprep.subr.bf16.mxu1 %v2039_v55  ;;  %v149_v55 = vld [vmem:[#allocation5 + $0x1f0] sm:$0xff]  ;;  %v2061_v60 = vpack.c.bf16 %v147_v52, %v139_v51  ;;  %v2207_v51 = vpack.c.bf16 %v230_v44, %v222_v43 }
  0xd7   :  { %v229_v52 = vld [vmem:[#allocation5 + $0x470] sm:$0xff] }
  0xd8   :  { %1914 = vmatpush1.bf16.msra.mxu0 %v1913_v61  ;;  %v2063_v61 = vpack.c.bf16 %v164_v57, %v156_v56  ;;  %v246_v56 = vld [vmem:[#allocation5 + $0x4f8] sm:$0xff] }
  0xd9   :  { %2042 = vmatpush1.bf16.msra.mxu1 %v2041_v62  ;;  %1916 = vmatprep.subr.bf16.mxu0 %v1915_v63  ;;  %v155_v62 = vld [vmem:[#allocation5 + $0x220] sm:$0xff] }
  0xda   :  { %2044 = vmatprep.subr.bf16.mxu1 %v2043_v3  ;;  %v163_v63 = vld [vmem:[#allocation5 + $0x260] sm:$0xff]  ;;  %v172_v3 = vld [vmem:[#allocation5 + $0x2a8] sm:$0xff] }
  0xdb   :  { %v2065_v7 = vpack.c.bf16 %v163_v63, %v155_v62  ;;  %v245_v63 = vld [vmem:[#allocation5 + $0x4f0] sm:$0xff] }
  0xdc   :  { %1918 = vmatpush1.bf16.msra.mxu0 %v1917_v9  ;;  %v2067_v9 = vpack.c.bf16 %v180_v4, %v172_v3  ;;  %v262_v3 = vld [vmem:[#allocation5 + $0x578] sm:$0xff] }
  0xdd   :  { %2046 = vmatpush1.bf16.msra.mxu1 %v2045_v10  ;;  %2048 = vmatprep.subr.bf16.mxu0 %v2047_v11  ;;  %v171_v10 = vld [vmem:[#allocation5 + $0x2a0] sm:$0xff] }
  0xde   :  { %2176 = vmatprep.subr.bf16.mxu1 %v2175_v15  ;;  %v179_v11 = vld [vmem:[#allocation5 + $0x2e0] sm:$0xff]  ;;  %v188_v15 = vld [vmem:[#allocation5 + $0x328] sm:$0xff] }
  0xdf   :  { %777 = vmatmul.mubr.f32.vlgmr.msra.gmra.mrb[0].mxu0 %v85_v22  ;;  %v2069_v20 = vpack.c.bf16 %v179_v11, %v171_v10  ;;  %v2215_v10 = vpack.c.bf16 %v262_v3, %v254_v2  ;;  %v261_v11 = vld [vmem:[#allocation5 + $0x570] sm:$0xff] }
  0xe0   :  { %919 = vmatmul.mubr.f32.vlgmr.msra.gmra.mrb[0].mxu1 %v85_v22  ;;  %2050 = vmatpush1.bf16.msra.mxu0 %v2049_v23  ;;  %v2071_v22 = vpack.c.bf16 %v196_v17, %v188_v15  ;;  %v187_v23 = vld [vmem:[#allocation5 + $0x320] sm:$0xff]  ;;  %v278_v15 = vld [vmem:[#allocation5 + $0x5f8] sm:$0xff] }
  0xe1   :  { %2178 = vmatpush1.bf16.msra.mxu1 %v2177_v25  ;;  %2052 = vmatprep.subr.bf16.mxu0 %v2051_v26  ;;  %v195_v25 = vld [vmem:[#allocation5 + $0x360] sm:$0xff]  ;;  %v189_v26 = vld [vmem:[#allocation5 + $0x330] sm:$0xff] }
  0xe2   :  { %2180 = vmatprep.subr.bf16.mxu1 %v2179_v30  ;;  %989 = vmatprep.mubr.f32.mxu0 %v2699_v16  ;;  %v212_v30 = vld [vmem:[#allocation5 + $0x3e8] sm:$0xff]  ;;  %v2073_v33 = vpack.c.bf16 %v195_v25, %v187_v23  ;;  %v2201_v34 = vpack.c.bf16 %v197_v28, %v189_v26  ;;  %v2219_v23 = vpack.c.bf16 %v278_v15, %v270_v14  ;;  %v277_v25 = vld [vmem:[#allocation5 + $0x5f0] sm:$0xff]  ;;  %v286_v28 = vld [vmem:[#allocation5 + $0x638] sm:$0xff] }
  0xe3   :  { %1131 = vmatprep.mubr.f32.mxu1 %v2699_v16  ;;  %v2189_v16 = vpack.c.bf16 %v149_v55, %v141_v53  ;;  %v2075_v35 = vpack.c.bf16 %v212_v30, %v204_v29  ;;  %v236_v53 = vld [vmem:[#allocation5 + $0x4a8] sm:$0xff]  ;;  %v238_v55 = vld [vmem:[#allocation5 + $0x4b8] sm:$0xff] }
  0xe4   :  { %2054 = vmatpush1.bf16.msra.mxu0 %v2053_v36  ;;  %v203_v36 = vld [vmem:[#allocation5 + $0x3a0] sm:$0xff]  ;;  %v2211_v62 = vpack.c.bf16 %v246_v56, %v238_v55  ;;  %v284_v26 = vld [vmem:[#allocation5 + $0x628] sm:$0xff]  ;;  %v294_v29 = vld [vmem:[#allocation5 + $0x678] sm:$0xff] }
  0xe5   :  { %2182 = vmatpush1.bf16.msra.mxu1 %v2181_v37  ;;  %2056 = vmatprep.subr.bf16.mxu0 %v2055_v38  ;;  %v211_v37 = vld [vmem:[#allocation5 + $0x3e0] sm:$0xff]  ;;  %v205_v38 = vld [vmem:[#allocation5 + $0x3b0] sm:$0xff] }
  0xe6   :  { %2184 = vmatprep.subr.bf16.mxu1 %v2183_v42  ;;  %v228_v42 = vld [vmem:[#allocation5 + $0x468] sm:$0xff]  ;;  %v2077_v45 = vpack.c.bf16 %v211_v37, %v203_v36  ;;  %v2205_v46 = vpack.c.bf16 %v213_v40, %v205_v38  ;;  %v2223_v36 = vpack.c.bf16 %v294_v29, %v286_v28  ;;  %v293_v37 = vld [vmem:[#allocation5 + $0x670] sm:$0xff]  ;;  %v302_v40 = vld [vmem:[#allocation5 + $0x6b8] sm:$0xff] }
  0xe7   :  { %v2079_v47 = vpack.c.bf16 %v228_v42, %v220_v41  ;;  %v300_v38 = vld [vmem:[#allocation5 + $0x6a8] sm:$0xff]  ;;  %v310_v41 = vld [vmem:[#allocation5 + $0x6f8] sm:$0xff] }
  0xe8   :  { %2058 = vmatpush1.bf16.msra.mxu0 %v2057_v48  ;;  %v219_v48 = vld [vmem:[#allocation5 + $0x420] sm:$0xff] }
  0xe9   :  { %2186 = vmatpush1.bf16.msra.mxu1 %v2185_v49  ;;  %2060 = vmatprep.subr.bf16.mxu0 %v2059_v50  ;;  %v227_v49 = vld [vmem:[#allocation5 + $0x460] sm:$0xff]  ;;  %v221_v50 = vld [vmem:[#allocation5 + $0x430] sm:$0xff] }
  0xea   :  { %2188 = vmatprep.subr.bf16.mxu1 %v2187_v54  ;;  %v244_v54 = vld [vmem:[#allocation5 + $0x4e8] sm:$0xff]  ;;  %v2081_v57 = vpack.c.bf16 %v227_v49, %v219_v48  ;;  %v2209_v58 = vpack.c.bf16 %v229_v52, %v221_v50  ;;  %v2227_v48 = vpack.c.bf16 %v310_v41, %v302_v40  ;;  %v309_v49 = vld [vmem:[#allocation5 + $0x6f0] sm:$0xff]  ;;  %v318_v52 = vld [vmem:[#allocation5 + $0x738] sm:$0xff] }
  0xeb   :  { %v2083_v59 = vpack.c.bf16 %v244_v54, %v236_v53  ;;  %v316_v50 = vld [vmem:[#allocation5 + $0x728] sm:$0xff]  ;;  %v326_v53 = vld [vmem:[#allocation5 + $0x778] sm:$0xff] }
  0xec   :  { %2062 = vmatpush1.bf16.msra.mxu0 %v2061_v60  ;;  %v235_v60 = vld [vmem:[#allocation5 + $0x4a0] sm:$0xff] }
  0xed   :  { %2190 = vmatpush1.bf16.msra.mxu1 %v2189_v16  ;;  %2064 = vmatprep.subr.bf16.mxu0 %v2063_v61  ;;  %v243_v16 = vld [vmem:[#allocation5 + $0x4e0] sm:$0xff]  ;;  %v237_v61 = vld [vmem:[#allocation5 + $0x4b0] sm:$0xff] }
  0xee   :  { %2192 = vmatprep.subr.bf16.mxu1 %v2191_v1  ;;  %v260_v1 = vld [vmem:[#allocation5 + $0x568] sm:$0xff]  ;;  %v2085_v4 = vpack.c.bf16 %v243_v16, %v235_v60  ;;  %v2213_v5 = vpack.c.bf16 %v245_v63, %v237_v61  ;;  %v2231_v60 = vpack.c.bf16 %v326_v53, %v318_v52  ;;  %v325_v16 = vld [vmem:[#allocation5 + $0x770] sm:$0xff]  ;;  %v334_v63 = vld [vmem:[#allocation5 + $0x7b8] sm:$0xff] }
  0xef   :  { %v2087_v6 = vpack.c.bf16 %v260_v1, %v252_v0  ;;  %v332_v61 = vld [vmem:[#allocation5 + $0x7a8] sm:$0xff]  ;;  %v342_v0 = vld [vmem:[#allocation5 + $0x7f8] sm:$0xff] }
  0xf0   :  { %2066 = vmatpush1.bf16.msra.mxu0 %v2065_v7  ;;  %v251_v7 = vld [vmem:[#allocation5 + $0x520] sm:$0xff] }
  0xf1   :  { %2194 = vmatpush1.bf16.msra.mxu1 %v2193_v8  ;;  %2068 = vmatprep.subr.bf16.mxu0 %v2067_v9  ;;  %v259_v8 = vld [vmem:[#allocation5 + $0x560] sm:$0xff]  ;;  %v253_v9 = vld [vmem:[#allocation5 + $0x530] sm:$0xff] }
  0xf2   :  { %2196 = vmatprep.subr.bf16.mxu1 %v2195_v13  ;;  %v276_v13 = vld [vmem:[#allocation5 + $0x5e8] sm:$0xff]  ;;  %v2089_v17 = vpack.c.bf16 %v259_v8, %v251_v7  ;;  %v2217_v18 = vpack.c.bf16 %v261_v11, %v253_v9  ;;  %v2235_v7 = vpack.c.bf16 %v342_v0, %v334_v63  ;;  %v341_v8 = vld [vmem:[#allocation5 + $0x7f0] sm:$0xff]  ;;  %v350_v11 = vld [vmem:[#allocation5 + $0x838] sm:$0xff] }
  0xf3   :  { %v2091_v19 = vpack.c.bf16 %v276_v13, %v268_v12  ;;  %v348_v9 = vld [vmem:[#allocation5 + $0x828] sm:$0xff]  ;;  %v358_v12 = vld [vmem:[#allocation5 + $0x878] sm:$0xff] }
  0xf4   :  { %2070 = vmatpush1.bf16.msra.mxu0 %v2069_v20  ;;  %v267_v20 = vld [vmem:[#allocation5 + $0x5a0] sm:$0xff] }
  0xf5   :  { %2198 = vmatpush1.bf16.msra.mxu1 %v2197_v21  ;;  %2072 = vmatprep.subr.bf16.mxu0 %v2071_v22  ;;  %v275_v21 = vld [vmem:[#allocation5 + $0x5e0] sm:$0xff]  ;;  %v269_v22 = vld [vmem:[#allocation5 + $0x5b0] sm:$0xff] }
  0xf6   :  { %2200 = vmatprep.subr.bf16.mxu1 %v2199_v27  ;;  %v292_v27 = vld [vmem:[#allocation5 + $0x668] sm:$0xff]  ;;  %v2093_v30 = vpack.c.bf16 %v275_v21, %v267_v20  ;;  %v2221_v31 = vpack.c.bf16 %v277_v25, %v269_v22  ;;  %v2239_v20 = vpack.c.bf16 %v358_v12, %v350_v11  ;;  %v357_v21 = vld [vmem:[#allocation5 + $0x870] sm:$0xff]  ;;  %v366_v25 = vld [vmem:[#allocation5 + $0x8b8] sm:$0xff] }
  0xf7   :  { %v2095_v32 = vpack.c.bf16 %v292_v27, %v284_v26  ;;  %v364_v22 = vld [vmem:[#allocation5 + $0x8a8] sm:$0xff]  ;;  %v374_v26 = vld [vmem:[#allocation5 + $0x8f8] sm:$0xff] }
  0xf8   :  { %2074 = vmatpush1.bf16.msra.mxu0 %v2073_v33  ;;  %v283_v33 = vld [vmem:[#allocation5 + $0x620] sm:$0xff] }
  0xf9   :  { %2202 = vmatpush1.bf16.msra.mxu1 %v2201_v34  ;;  %2076 = vmatprep.subr.bf16.mxu0 %v2075_v35  ;;  %v291_v34 = vld [vmem:[#allocation5 + $0x660] sm:$0xff]  ;;  %v285_v35 = vld [vmem:[#allocation5 + $0x630] sm:$0xff] }
  0xfa   :  { %2204 = vmatprep.subr.bf16.mxu1 %v2203_v39  ;;  %v308_v39 = vld [vmem:[#allocation5 + $0x6e8] sm:$0xff]  ;;  %v2097_v42 = vpack.c.bf16 %v291_v34, %v283_v33  ;;  %v2225_v43 = vpack.c.bf16 %v293_v37, %v285_v35  ;;  %v2243_v33 = vpack.c.bf16 %v374_v26, %v366_v25  ;;  %v373_v34 = vld [vmem:[#allocation5 + $0x8f0] sm:$0xff]  ;;  %v2457_v37 = vld [vmem:[#allocation2] sm:$0xff] }
  0xfb   :  { %v2099_v44 = vpack.c.bf16 %v308_v39, %v300_v38  ;;  %v380_v35 = vld [vmem:[#allocation5 + $0x928] sm:$0xff]  ;;  %v382_v38 = vld [vmem:[#allocation5 + $0x938] sm:$0xff] }
  0xfc   :  { %2078 = vmatpush1.bf16.msra.mxu0 %v2077_v45  ;;  %v299_v45 = vld [vmem:[#allocation5 + $0x6a0] sm:$0xff]  ;;  %v390_v39 = vld [vmem:[#allocation5 + $0x978] sm:$0xff] }
  0xfd   :  { %2206 = vmatpush1.bf16.msra.mxu1 %v2205_v46  ;;  %2080 = vmatprep.subr.bf16.mxu0 %v2079_v47  ;;  %v307_v46 = vld [vmem:[#allocation5 + $0x6e0] sm:$0xff]  ;;  %v301_v47 = vld [vmem:[#allocation5 + $0x6b0] sm:$0xff] }
  0xfe   :  { %2208 = vmatprep.subr.bf16.mxu1 %v2207_v51  ;;  %v324_v51 = vld [vmem:[#allocation5 + $0x768] sm:$0xff]  ;;  %v2101_v54 = vpack.c.bf16 %v307_v46, %v299_v45  ;;  %v2229_v55 = vpack.c.bf16 %v309_v49, %v301_v47  ;;  %v381_v45 = vld [vmem:[#allocation5 + $0x930] sm:$0xff]  ;;  %v2247_v46 = vpack.c.bf16 %v390_v39, %v382_v38  ;;  %v459_v39 = vld [vmem:[#allocation5 + $0xba0] sm:$0xff] }
  0xff   :  { %v2103_v56 = vpack.c.bf16 %v324_v51, %v316_v50  ;;  %v389_v47 = vld [vmem:[#allocation5 + $0x970] sm:$0xff]  ;;  %v404_v49 = vld [vmem:[#allocation5 + $0x9e8] sm:$0xff]  ;;  %v398_v50 = vld [vmem:[#allocation5 + $0x9b8] sm:$0xff] }
 0x100   :  { %2082 = vmatpush1.bf16.msra.mxu0 %v2081_v57  ;;  %v315_v57 = vld [vmem:[#allocation5 + $0x720] sm:$0xff]  ;;  %v406_v51 = vld [vmem:[#allocation5 + $0x9f8] sm:$0xff]  ;;  %v2249_v53 = vpack.c.bf16 %v389_v47, %v381_v45  ;;  %v484_v45 = vld [vmem:[#allocation5 + $0xc68] sm:$0xff] }
 0x101   :  { %2210 = vmatpush1.bf16.msra.mxu1 %v2209_v58  ;;  %2084 = vmatprep.subr.bf16.mxu0 %v2083_v59  ;;  %v323_v58 = vld [vmem:[#allocation5 + $0x760] sm:$0xff]  ;;  %v317_v59 = vld [vmem:[#allocation5 + $0x730] sm:$0xff]  ;;  %v486_v47 = vld [vmem:[#allocation5 + $0xc78] sm:$0xff] }
 0x102   :  { %2212 = vmatprep.subr.bf16.mxu1 %v2211_v62  ;;  %v340_v62 = vld [vmem:[#allocation5 + $0x7e8] sm:$0xff]  ;;  %v2105_v1 = vpack.c.bf16 %v323_v58, %v315_v57  ;;  %v2233_v2 = vpack.c.bf16 %v325_v16, %v317_v59  ;;  %v397_v57 = vld [vmem:[#allocation5 + $0x9b0] sm:$0xff]  ;;  %v2251_v58 = vpack.c.bf16 %v406_v51, %v398_v50  ;;  %v475_v51 = vld [vmem:[#allocation5 + $0xc20] sm:$0xff] }
 0x103   :  { %v2107_v3 = vpack.c.bf16 %v340_v62, %v332_v61  ;;  %v405_v59 = vld [vmem:[#allocation5 + $0x9f0] sm:$0xff]  ;;  %v420_v16 = vld [vmem:[#allocation5 + $0xa68] sm:$0xff]  ;;  %v414_v61 = vld [vmem:[#allocation5 + $0xa38] sm:$0xff] }
 0x104   :  { %2086 = vmatpush1.bf16.msra.mxu0 %v2085_v4  ;;  %v331_v4 = vld [vmem:[#allocation5 + $0x7a0] sm:$0xff]  ;;  %v422_v62 = vld [vmem:[#allocation5 + $0xa78] sm:$0xff] }
 0x105   :  { %2214 = vmatpush1.bf16.msra.mxu1 %v2213_v5  ;;  %2088 = vmatprep.subr.bf16.mxu0 %v2087_v6  ;;  %v339_v5 = vld [vmem:[#allocation5 + $0x7e0] sm:$0xff]  ;;  %v333_v6 = vld [vmem:[#allocation5 + $0x7b0] sm:$0xff] }
 0x106   :  { %2216 = vmatprep.subr.bf16.mxu1 %v2215_v10  ;;  %v356_v10 = vld [vmem:[#allocation5 + $0x868] sm:$0xff]  ;;  %v2109_v13 = vpack.c.bf16 %v339_v5, %v331_v4  ;;  %v2237_v14 = vpack.c.bf16 %v341_v8, %v333_v6  ;;  %v2255_v4 = vpack.c.bf16 %v422_v62, %v414_v61  ;;  %v421_v5 = vld [vmem:[#allocation5 + $0xa70] sm:$0xff]  ;;  %v430_v8 = vld [vmem:[#allocation5 + $0xab8] sm:$0xff] }
 0x107   :  { %v2111_v15 = vpack.c.bf16 %v356_v10, %v348_v9  ;;  %v428_v6 = vld [vmem:[#allocation5 + $0xaa8] sm:$0xff]  ;;  %v438_v9 = vld [vmem:[#allocation5 + $0xaf8] sm:$0xff]  ;;  %v491_v62 = vld [vmem:[#allocation5 + $0xca0] sm:$0xff] }
 0x108   :  { %2090 = vmatpush1.bf16.msra.mxu0 %v2089_v17  ;;  %v347_v17 = vld [vmem:[#allocation5 + $0x820] sm:$0xff] }
 0x109   :  { %2218 = vmatpush1.bf16.msra.mxu1 %v2217_v18  ;;  %2092 = vmatprep.subr.bf16.mxu0 %v2091_v19  ;;  %v355_v18 = vld [vmem:[#allocation5 + $0x860] sm:$0xff]  ;;  %v349_v19 = vld [vmem:[#allocation5 + $0x830] sm:$0xff] }
 0x10a   :  { %2220 = vmatprep.subr.bf16.mxu1 %v2219_v23  ;;  %v372_v23 = vld [vmem:[#allocation5 + $0x8e8] sm:$0xff]  ;;  %v2113_v27 = vpack.c.bf16 %v355_v18, %v347_v17  ;;  %v2241_v28 = vpack.c.bf16 %v357_v21, %v349_v19  ;;  %v2259_v17 = vpack.c.bf16 %v438_v9, %v430_v8  ;;  %v437_v18 = vld [vmem:[#allocation5 + $0xaf0] sm:$0xff]  ;;  %v446_v21 = vld [vmem:[#allocation5 + $0xb38] sm:$0xff] }
 0x10b   :  { %v2115_v29 = vpack.c.bf16 %v372_v23, %v364_v22  ;;  %v444_v19 = vld [vmem:[#allocation5 + $0xb28] sm:$0xff]  ;;  %v454_v22 = vld [vmem:[#allocation5 + $0xb78] sm:$0xff]  ;;  %v507_v9 = vld [vmem:[#allocation5 + $0xd20] sm:$0xff] }
 0x10c   :  { %2094 = vmatpush1.bf16.msra.mxu0 %v2093_v30  ;;  %v363_v30 = vld [vmem:[#allocation5 + $0x8a0] sm:$0xff] }
 0x10d   :  { %2222 = vmatpush1.bf16.msra.mxu1 %v2221_v31  ;;  %2096 = vmatprep.subr.bf16.mxu0 %v2095_v32  ;;  %v371_v31 = vld [vmem:[#allocation5 + $0x8e0] sm:$0xff]  ;;  %v365_v32 = vld [vmem:[#allocation5 + $0x8b0] sm:$0xff] }
 0x10e   :  { %2224 = vmatprep.subr.bf16.mxu1 %v2223_v36  ;;  %v388_v36 = vld [vmem:[#allocation5 + $0x968] sm:$0xff]  ;;  %v2117_v40 = vpack.c.bf16 %v371_v31, %v363_v30  ;;  %v2245_v41 = vpack.c.bf16 %v373_v34, %v365_v32  ;;  %v2263_v30 = vpack.c.bf16 %v454_v22, %v446_v21  ;;  %v453_v31 = vld [vmem:[#allocation5 + $0xb70] sm:$0xff]  ;;  %v462_v34 = vld [vmem:[#allocation5 + $0xbb8] sm:$0xff] }
 0x10f   :  { %v460_v32 = vld [vmem:[#allocation5 + $0xba8] sm:$0xff]  ;;  %v523_v22 = vld [vmem:[#allocation5 + $0xda0] sm:$0xff] }
 0x110   :  { %2098 = vmatpush1.bf16.msra.mxu0 %v2097_v42  ;;  %v2119_v42 = vpack.c.bf16 %v388_v36, %v380_v35  ;;  %v470_v35 = vld [vmem:[#allocation5 + $0xbf8] sm:$0xff] }
 0x111   :  { %2226 = vmatpush1.bf16.msra.mxu1 %v2225_v43  ;;  %2100 = vmatprep.subr.bf16.mxu0 %v2099_v44  ;;  %v379_v43 = vld [vmem:[#allocation5 + $0x920] sm:$0xff] }
 0x112   :  { %2228 = vmatprep.subr.bf16.mxu1 %v2227_v48  ;;  %v387_v44 = vld [vmem:[#allocation5 + $0x960] sm:$0xff]  ;;  %v396_v48 = vld [vmem:[#allocation5 + $0x9a8] sm:$0xff] }
 0x113   :  { %v2121_v52 = vpack.c.bf16 %v387_v44, %v379_v43  ;;  %v469_v43 = vld [vmem:[#allocation5 + $0xbf0] sm:$0xff]  ;;  %v476_v44 = vld [vmem:[#allocation5 + $0xc28] sm:$0xff] }
 0x114   :  { %2102 = vmatpush1.bf16.msra.mxu0 %v2101_v54  ;;  %v2123_v54 = vpack.c.bf16 %v404_v49, %v396_v48  ;;  %v2143_v50 = vpack.c.bf16 %v484_v45, %v476_v44 }
 0x115   :  { %2230 = vmatpush1.bf16.msra.mxu1 %v2229_v55  ;;  %2104 = vmatprep.subr.bf16.mxu0 %v2103_v56  ;;  %v395_v55 = vld [vmem:[#allocation5 + $0x9a0] sm:$0xff] }
 0x116   :  { %2232 = vmatprep.subr.bf16.mxu1 %v2231_v60  ;;  %v403_v56 = vld [vmem:[#allocation5 + $0x9e0] sm:$0xff]  ;;  %v412_v60 = vld [vmem:[#allocation5 + $0xa28] sm:$0xff] }
 0x117   :  { %v2125_v63 = vpack.c.bf16 %v403_v56, %v395_v55  ;;  %v2127_v0 = vpack.c.bf16 %v420_v16, %v412_v60  ;;  %v485_v55 = vld [vmem:[#allocation5 + $0xc70] sm:$0xff]  ;;  %v492_v56 = vld [vmem:[#allocation5 + $0xca8] sm:$0xff] }
 0x118   :  { %2106 = vmatpush1.bf16.msra.mxu0 %v2105_v1  ;;  %v411_v1 = vld [vmem:[#allocation5 + $0xa20] sm:$0xff] }
 0x119   :  { %2234 = vmatpush1.bf16.msra.mxu1 %v2233_v2  ;;  %2108 = vmatprep.subr.bf16.mxu0 %v2107_v3  ;;  %v419_v2 = vld [vmem:[#allocation5 + $0xa60] sm:$0xff]  ;;  %v413_v3 = vld [vmem:[#allocation5 + $0xa30] sm:$0xff] }
 0x11a   :  { %2236 = vmatprep.subr.bf16.mxu1 %v2235_v7  ;;  %v436_v7 = vld [vmem:[#allocation5 + $0xae8] sm:$0xff]  ;;  %v2129_v10 = vpack.c.bf16 %v419_v2, %v411_v1  ;;  %v2257_v11 = vpack.c.bf16 %v421_v5, %v413_v3  ;;  %v501_v1 = vld [vmem:[#allocation5 + $0xcf0] sm:$0xff]  ;;  %v518_v5 = vld [vmem:[#allocation5 + $0xd78] sm:$0xff] }
 0x11b   :  { %v2131_v12 = vpack.c.bf16 %v436_v7, %v428_v6  ;;  %v508_v2 = vld [vmem:[#allocation5 + $0xd28] sm:$0xff] }
 0x11c   :  { %2110 = vmatpush1.bf16.msra.mxu0 %v2109_v13  ;;  %v427_v13 = vld [vmem:[#allocation5 + $0xaa0] sm:$0xff]  ;;  %v516_v3 = vld [vmem:[#allocation5 + $0xd68] sm:$0xff] }
 0x11d   :  { %2238 = vmatpush1.bf16.msra.mxu1 %v2237_v14  ;;  %2112 = vmatprep.subr.bf16.mxu0 %v2111_v15  ;;  %v435_v14 = vld [vmem:[#allocation5 + $0xae0] sm:$0xff]  ;;  %v429_v15 = vld [vmem:[#allocation5 + $0xab0] sm:$0xff]  ;;  %v2151_v8 = vpack.c.bf16 %v516_v3, %v508_v2 }
 0x11e   :  { %2240 = vmatprep.subr.bf16.mxu1 %v2239_v20  ;;  %v452_v20 = vld [vmem:[#allocation5 + $0xb68] sm:$0xff]  ;;  %v2133_v23 = vpack.c.bf16 %v435_v14, %v427_v13  ;;  %v2261_v25 = vpack.c.bf16 %v437_v18, %v429_v15  ;;  %v517_v13 = vld [vmem:[#allocation5 + $0xd70] sm:$0xff]  ;;  %v534_v18 = vld [vmem:[#allocation5 + $0xdf8] sm:$0xff] }
 0x11f   :  { %990 = vmatmul.mubr.f32.vlgmr.msra.gmra.mrb[2].mxu0 %v2457_v37  ;;  %v2135_v26 = vpack.c.bf16 %v452_v20, %v444_v19  ;;  %v524_v14 = vld [vmem:[#allocation5 + $0xda8] sm:$0xff] }
 0x120   :  { %2114 = vmatpush1.bf16.msra.mxu0 %v2113_v27  ;;  %1132 = vmatmul.mubr.f32.vlgmr.msra.gmra.mrb[2].mxu1 %v2457_v37  ;;  %v443_v27 = vld [vmem:[#allocation5 + $0xb20] sm:$0xff]  ;;  %v532_v15 = vld [vmem:[#allocation5 + $0xde8] sm:$0xff] }
 0x121   :  { %2242 = vmatpush1.bf16.msra.mxu1 %v2241_v28  ;;  %2116 = vmatprep.subr.bf16.mxu0 %v2115_v29  ;;  %v451_v28 = vld [vmem:[#allocation5 + $0xb60] sm:$0xff]  ;;  %v445_v29 = vld [vmem:[#allocation5 + $0xb30] sm:$0xff]  ;;  %v2155_v21 = vpack.c.bf16 %v532_v15, %v524_v14 }
 0x122   :  { %2244 = vmatprep.subr.bf16.mxu1 %v2243_v33  ;;  %1060 = vmatprep.mubr.f32.mxu0 %v2703_v24  ;;  %v468_v33 = vld [vmem:[#allocation5 + $0xbe8] sm:$0xff]  ;;  %v2137_v36 = vpack.c.bf16 %v451_v28, %v443_v27  ;;  %v2265_v37 = vpack.c.bf16 %v453_v31, %v445_v29  ;;  %v533_v27 = vld [vmem:[#allocation5 + $0xdf0] sm:$0xff]  ;;  %v550_v31 = vld [vmem:[#allocation5 + $0xe78] sm:$0xff] }
 0x123   :  { %1202 = vmatprep.mubr.f32.mxu1 %v2703_v24  ;;  %v2253_v24 = vpack.c.bf16 %v405_v59, %v397_v57  ;;  %v2139_v38 = vpack.c.bf16 %v468_v33, %v460_v32  ;;  %v500_v57 = vld [vmem:[#allocation5 + $0xce8] sm:$0xff]  ;;  %v502_v59 = vld [vmem:[#allocation5 + $0xcf8] sm:$0xff] }
 0x124   :  { %2118 = vmatpush1.bf16.msra.mxu0 %v2117_v40  ;;  %v467_v40 = vld [vmem:[#allocation5 + $0xbe0] sm:$0xff]  ;;  %v2147_v61 = vpack.c.bf16 %v500_v57, %v492_v56  ;;  %v540_v28 = vld [vmem:[#allocation5 + $0xe28] sm:$0xff] }
 0x125   :  { %2246 = vmatpush1.bf16.msra.mxu1 %v2245_v41  ;;  %2120 = vmatprep.subr.bf16.mxu0 %v2119_v42  ;;  %v461_v41 = vld [vmem:[#allocation5 + $0xbb0] sm:$0xff]  ;;  %v2267_v42 = vpack.c.bf16 %v470_v35, %v462_v34  ;;  %v2141_v48 = vpack.c.bf16 %v467_v40, %v459_v39  ;;  %v548_v29 = vld [vmem:[#allocation5 + $0xe68] sm:$0xff]  ;;  %v539_v35 = vld [vmem:[#allocation5 + $0xe20] sm:$0xff] }
 0x126   :  { %2248 = vmatprep.subr.bf16.mxu1 %v2247_v46  ;;  %v478_v46 = vld [vmem:[#allocation5 + $0xc38] sm:$0xff]  ;;  %v2269_v49 = vpack.c.bf16 %v469_v43, %v461_v41  ;;  %v2159_v34 = vpack.c.bf16 %v548_v29, %v540_v28  ;;  %v549_v39 = vld [vmem:[#allocation5 + $0xe70] sm:$0xff]  ;;  %v556_v40 = vld [vmem:[#allocation5 + $0xea8] sm:$0xff] }
 0x127   :  { %v564_v41 = vld [vmem:[#allocation5 + $0xee8] sm:$0xff]  ;;  %v566_v43 = vld [vmem:[#allocation5 + $0xef8] sm:$0xff] }
 0x128   :  { %2122 = vmatpush1.bf16.msra.mxu0 %v2121_v52  ;;  %v483_v52 = vld [vmem:[#allocation5 + $0xc60] sm:$0xff] }
 0x129   :  { %2250 = vmatpush1.bf16.msra.mxu1 %v2249_v53  ;;  %2124 = vmatprep.subr.bf16.mxu0 %v2123_v54  ;;  %v477_v53 = vld [vmem:[#allocation5 + $0xc30] sm:$0xff]  ;;  %v2271_v54 = vpack.c.bf16 %v486_v47, %v478_v46  ;;  %v2145_v60 = vpack.c.bf16 %v483_v52, %v475_v51  ;;  %v2163_v46 = vpack.c.bf16 %v564_v41, %v556_v40  ;;  %v555_v47 = vld [vmem:[#allocation5 + $0xea0] sm:$0xff]  ;;  %v572_v52 = vld [vmem:[#allocation5 + $0xf28] sm:$0xff] }
 0x12a   :  { %2252 = vmatprep.subr.bf16.mxu1 %v2251_v58  ;;  %v494_v58 = vld [vmem:[#allocation5 + $0xcb8] sm:$0xff]  ;;  %v2273_v16 = vpack.c.bf16 %v485_v55, %v477_v53  ;;  %v565_v51 = vld [vmem:[#allocation5 + $0xef0] sm:$0xff]  ;;  %v580_v53 = vld [vmem:[#allocation5 + $0xf68] sm:$0xff] }
 0x12b   :  { %v582_v55 = vld [vmem:[#allocation5 + $0xf78] sm:$0xff]  ;;  %v1270_v40 = vld [vmem:[#allocation8 + $0x1a8] sm:$0xff] }
 0x12c   :  { %2126 = vmatpush1.bf16.msra.mxu0 %v2125_v63  ;;  %v499_v63 = vld [vmem:[#allocation5 + $0xce0] sm:$0xff] }
 0x12d   :  { %2254 = vmatpush1.bf16.msra.mxu1 %v2253_v24  ;;  %2128 = vmatprep.subr.bf16.mxu0 %v2127_v0  ;;  %v493_v24 = vld [vmem:[#allocation5 + $0xcb0] sm:$0xff]  ;;  %v2275_v0 = vpack.c.bf16 %v502_v59, %v494_v58  ;;  %v2149_v6 = vpack.c.bf16 %v499_v63, %v491_v62  ;;  %v2167_v58 = vpack.c.bf16 %v580_v53, %v572_v52  ;;  %v571_v59 = vld [vmem:[#allocation5 + $0xf20] sm:$0xff]  ;;  %v588_v63 = vld [vmem:[#allocation5 + $0xfa8] sm:$0xff] }
 0x12e   :  { %2256 = vmatprep.subr.bf16.mxu1 %v2255_v4  ;;  %v510_v4 = vld [vmem:[#allocation5 + $0xd38] sm:$0xff]  ;;  %v2277_v7 = vpack.c.bf16 %v501_v1, %v493_v24  ;;  %v581_v62 = vld [vmem:[#allocation5 + $0xf70] sm:$0xff]  ;;  %v596_v24 = vld [vmem:[#allocation5 + $0xfe8] sm:$0xff] }
 0x12f   :  { %v598_v1 = vld [vmem:[#allocation5 + $0xff8] sm:$0xff]  ;;  %v1272_v52 = vld [vmem:[#allocation8 + $0x1b8] sm:$0xff] }
 0x130   :  { %2130 = vmatpush1.bf16.msra.mxu0 %v2129_v10  ;;  %v515_v10 = vld [vmem:[#allocation5 + $0xd60] sm:$0xff] }
 0x131   :  { %2258 = vmatpush1.bf16.msra.mxu1 %v2257_v11  ;;  %2132 = vmatprep.subr.bf16.mxu0 %v2131_v12  ;;  %v509_v11 = vld [vmem:[#allocation5 + $0xd30] sm:$0xff]  ;;  %v2279_v12 = vpack.c.bf16 %v518_v5, %v510_v4  ;;  %v2153_v19 = vpack.c.bf16 %v515_v10, %v507_v9  ;;  %v2171_v4 = vpack.c.bf16 %v596_v24, %v588_v63  ;;  %v587_v5 = vld [vmem:[#allocation5 + $0xfa0] sm:$0xff]  ;;  %v1233_v10 = vld [vmem:[#allocation8 + $0x80] sm:$0xff] }
 0x132   :  { %2260 = vmatprep.subr.bf16.mxu1 %v2259_v17  ;;  %v526_v17 = vld [vmem:[#allocation5 + $0xdb8] sm:$0xff]  ;;  %v2281_v20 = vpack.c.bf16 %v517_v13, %v509_v11  ;;  %v597_v9 = vld [vmem:[#allocation5 + $0xff0] sm:$0xff] }
 0x133   :  { %v1234_v11 = vld [vmem:[#allocation8 + $0x88] sm:$0xff] }
 0x134   :  { %2134 = vmatpush1.bf16.msra.mxu0 %v2133_v23  ;;  %v531_v23 = vld [vmem:[#allocation5 + $0xde0] sm:$0xff]  ;;  %v1266_v13 = vld [vmem:[#allocation8 + $0x188] sm:$0xff] }
 0x135   :  { %2262 = vmatpush1.bf16.msra.mxu1 %v2261_v25  ;;  %2136 = vmatprep.subr.bf16.mxu0 %v2135_v26  ;;  %v525_v25 = vld [vmem:[#allocation5 + $0xdb0] sm:$0xff]  ;;  %v2283_v26 = vpack.c.bf16 %v534_v18, %v526_v17  ;;  %v2157_v32 = vpack.c.bf16 %v531_v23, %v523_v22  ;;  %v2303_v17 = vpack.c.bf16 %v1234_v11, %v1233_v10  ;;  %v1217_v18 = vld [vmem:[#allocation8] sm:$0xff]  ;;  %v1235_v23 = vld [vmem:[#allocation8 + $0x90] sm:$0xff] }
 0x136   :  { %2264 = vmatprep.subr.bf16.mxu1 %v2263_v30  ;;  %v542_v30 = vld [vmem:[#allocation5 + $0xe38] sm:$0xff]  ;;  %v2285_v33 = vpack.c.bf16 %v533_v27, %v525_v25  ;;  %v1250_v22 = vld [vmem:[#allocation8 + $0x108] sm:$0xff]  ;;  %v1236_v25 = vld [vmem:[#allocation8 + $0x98] sm:$0xff] }
 0x137   :  { %v1268_v27 = vld [vmem:[#allocation8 + $0x198] sm:$0xff]  ;;  %v1274_v63 = vld [vmem:[#allocation8 + $0x1c8] sm:$0xff] }
 0x138   :  { %2138 = vmatpush1.bf16.msra.mxu0 %v2137_v36  ;;  %v547_v36 = vld [vmem:[#allocation5 + $0xe60] sm:$0xff] }
 0x139   :  { %2266 = vmatpush1.bf16.msra.mxu1 %v2265_v37  ;;  %2140 = vmatprep.subr.bf16.mxu0 %v2139_v38  ;;  %v541_v37 = vld [vmem:[#allocation5 + $0xe30] sm:$0xff]  ;;  %v2287_v38 = vpack.c.bf16 %v550_v31, %v542_v30  ;;  %v2161_v44 = vpack.c.bf16 %v547_v36, %v539_v35  ;;  %v2307_v30 = vpack.c.bf16 %v1236_v25, %v1235_v23  ;;  %v1219_v31 = vld [vmem:[#allocation8 + $0x10] sm:$0xff]  ;;  %v1252_v35 = vld [vmem:[#allocation8 + $0x118] sm:$0xff] }
 0x13a   :  { %2268 = vmatprep.subr.bf16.mxu1 %v2267_v42  ;;  %v558_v42 = vld [vmem:[#allocation5 + $0xeb8] sm:$0xff]  ;;  %v2289_v45 = vpack.c.bf16 %v549_v39, %v541_v37  ;;  %v1237_v36 = vld [vmem:[#allocation8 + $0xa0] sm:$0xff]  ;;  %v1238_v37 = vld [vmem:[#allocation8 + $0xa8] sm:$0xff] }
 0x13b   :  { %v1269_v39 = vld [vmem:[#allocation8 + $0x1a0] sm:$0xff]  ;;  %v1276_v10 = vld [vmem:[#allocation8 + $0x1d8] sm:$0xff]  ;;  %v1278_v23 = vld [vmem:[#allocation8 + $0x1e8] sm:$0xff] }
 0x13c   :  { %2142 = vmatpush1.bf16.msra.mxu0 %v2141_v48  ;;  %v563_v48 = vld [vmem:[#allocation5 + $0xee0] sm:$0xff] }
 0x13d   :  { %2270 = vmatpush1.bf16.msra.mxu1 %v2269_v49  ;;  %2144 = vmatprep.subr.bf16.mxu0 %v2143_v50  ;;  %v557_v49 = vld [vmem:[#allocation5 + $0xeb0] sm:$0xff]  ;;  %v2291_v50 = vpack.c.bf16 %v566_v43, %v558_v42  ;;  %v2165_v56 = vpack.c.bf16 %v563_v48, %v555_v47  ;;  %v2311_v43 = vpack.c.bf16 %v1238_v37, %v1237_v36  ;;  %v1280_v36 = vld [vmem:[#allocation8 + $0x1f8] sm:$0xff] }
 0x13e   :  { %2272 = vmatprep.subr.bf16.mxu1 %v2271_v54  ;;  %v574_v54 = vld [vmem:[#allocation5 + $0xf38] sm:$0xff]  ;;  %v2293_v57 = vpack.c.bf16 %v565_v51, %v557_v49  ;;  %v2343_v47 = vpack.c.bf16 %v1270_v40, %v1269_v39  ;;  %v1254_v48 = vld [vmem:[#allocation8 + $0x128] sm:$0xff] }
 0x13f   :  { %v1239_v49 = vld [vmem:[#allocation8 + $0xb0] sm:$0xff] }
 0x140   :  { %2146 = vmatpush1.bf16.msra.mxu0 %v2145_v60  ;;  %v579_v60 = vld [vmem:[#allocation5 + $0xf60] sm:$0xff]  ;;  %v1271_v51 = vld [vmem:[#allocation8 + $0x1b0] sm:$0xff] }
 0x141   :  { %2274 = vmatpush1.bf16.msra.mxu1 %v2273_v16  ;;  %2148 = vmatprep.subr.bf16.mxu0 %v2147_v61  ;;  %v573_v16 = vld [vmem:[#allocation5 + $0xf30] sm:$0xff]  ;;  %v2295_v61 = vpack.c.bf16 %v582_v55, %v574_v54  ;;  %v2169_v2 = vpack.c.bf16 %v579_v60, %v571_v59  ;;  %v2347_v59 = vpack.c.bf16 %v1272_v52, %v1271_v51  ;;  %v1256_v60 = vld [vmem:[#allocation8 + $0x138] sm:$0xff]  ;;  %v1231_v40 = vld [vmem:[#allocation8 + $0x70] sm:$0xff] }
 0x142   :  { %2276 = vmatprep.subr.bf16.mxu1 %v2275_v0  ;;  %v590_v0 = vld [vmem:[#allocation5 + $0xfb8] sm:$0xff]  ;;  %v2297_v3 = vpack.c.bf16 %v581_v62, %v573_v16  ;;  %v1241_v16 = vld [vmem:[#allocation8 + $0xc0] sm:$0xff] }
 0x143   :  { %v1273_v62 = vld [vmem:[#allocation8 + $0x1c0] sm:$0xff] }
 0x144   :  { %2150 = vmatpush1.bf16.msra.mxu0 %v2149_v6  ;;  %v595_v6 = vld [vmem:[#allocation5 + $0xfe0] sm:$0xff] }
 0x145   :  { %2278 = vmatpush1.bf16.msra.mxu1 %v2277_v7  ;;  %2152 = vmatprep.subr.bf16.mxu0 %v2151_v8  ;;  %v589_v7 = vld [vmem:[#allocation5 + $0xfb0] sm:$0xff]  ;;  %v2299_v8 = vpack.c.bf16 %v598_v1, %v590_v0  ;;  %v2173_v14 = vpack.c.bf16 %v595_v6, %v587_v5  ;;  %v2351_v5 = vpack.c.bf16 %v1274_v63, %v1273_v62 }
 0x146   :  { %2280 = vmatprep.subr.bf16.mxu1 %v2279_v12  ;;  %v1265_v12 = vld [vmem:[#allocation8 + $0x180] sm:$0xff]  ;;  %v2301_v15 = vpack.c.bf16 %v597_v9, %v589_v7  ;;  %v1258_v6 = vld [vmem:[#allocation8 + $0x148] sm:$0xff]  ;;  %v1243_v7 = vld [vmem:[#allocation8 + $0xd0] sm:$0xff] }
 0x147   :  { %v1275_v9 = vld [vmem:[#allocation8 + $0x1d0] sm:$0xff] }
 0x148   :  { %2154 = vmatpush1.bf16.msra.mxu0 %v2153_v19  ;;  %v1218_v19 = vld [vmem:[#allocation8 + $0x8] sm:$0xff] }
 0x149   :  { %2282 = vmatpush1.bf16.msra.mxu1 %v2281_v20  ;;  %2156 = vmatprep.subr.bf16.mxu0 %v2155_v21  ;;  %v1249_v20 = vld [vmem:[#allocation8 + $0x100] sm:$0xff]  ;;  %v2335_v21 = vpack.c.bf16 %v1266_v13, %v1265_v12  ;;  %v2305_v28 = vpack.c.bf16 %v1218_v19, %v1217_v18  ;;  %v2355_v18 = vpack.c.bf16 %v1276_v10, %v1275_v9  ;;  %v1260_v19 = vld [vmem:[#allocation8 + $0x158] sm:$0xff]  ;;  %v1299_v9 = vld [vmem:[#allocation8 + $0x290] sm:$0xff] }
 0x14a   :  { %2284 = vmatprep.subr.bf16.mxu1 %v2283_v26  ;;  %v1267_v26 = vld [vmem:[#allocation8 + $0x190] sm:$0xff]  ;;  %v2337_v29 = vpack.c.bf16 %v1250_v22, %v1249_v20  ;;  %v1245_v20 = vld [vmem:[#allocation8 + $0xe0] sm:$0xff]  ;;  %v1300_v10 = vld [vmem:[#allocation8 + $0x298] sm:$0xff] }
 0x14b   :  { %v1277_v22 = vld [vmem:[#allocation8 + $0x1e0] sm:$0xff] }
 0x14c   :  { %2158 = vmatpush1.bf16.msra.mxu0 %v2157_v32  ;;  %v1220_v32 = vld [vmem:[#allocation8 + $0x18] sm:$0xff] }
 0x14d   :  { %2286 = vmatpush1.bf16.msra.mxu1 %v2285_v33  ;;  %2160 = vmatprep.subr.bf16.mxu0 %v2159_v34  ;;  %v1251_v33 = vld [vmem:[#allocation8 + $0x110] sm:$0xff]  ;;  %v2339_v34 = vpack.c.bf16 %v1268_v27, %v1267_v26  ;;  %v2309_v41 = vpack.c.bf16 %v1220_v32, %v1219_v31  ;;  %v2359_v31 = vpack.c.bf16 %v1278_v23, %v1277_v22  ;;  %v1262_v32 = vld [vmem:[#allocation8 + $0x168] sm:$0xff]  ;;  %v1284_v22 = vld [vmem:[#allocation8 + $0x218] sm:$0xff] }
 0x14e   :  { %2288 = vmatprep.subr.bf16.mxu1 %v2287_v38  ;;  %v2458_v38 = vld [vmem:[#allocation2 + $0x10] sm:$0xff]  ;;  %v2341_v42 = vpack.c.bf16 %v1252_v35, %v1251_v33  ;;  %v1247_v33 = vld [vmem:[#allocation8 + $0xf0] sm:$0xff] }
 0x14f   :  { %v1279_v35 = vld [vmem:[#allocation8 + $0x1f0] sm:$0xff] }
 0x150   :  { %2162 = vmatpush1.bf16.msra.mxu0 %v2161_v44  ;;  %v1221_v44 = vld [vmem:[#allocation8 + $0x20] sm:$0xff]  ;;  %v1315_v23 = vld [vmem:[#allocation8 + $0x310] sm:$0xff] }
 0x151   :  { %2290 = vmatpush1.bf16.msra.mxu1 %v2289_v45  ;;  %2164 = vmatprep.subr.bf16.mxu0 %v2163_v46  ;;  %v1222_v45 = vld [vmem:[#allocation8 + $0x28] sm:$0xff]  ;;  %v1253_v46 = vld [vmem:[#allocation8 + $0x120] sm:$0xff] }
 0x152   :  { %2292 = vmatprep.subr.bf16.mxu1 %v2291_v50  ;;  %v1240_v50 = vld [vmem:[#allocation8 + $0xb8] sm:$0xff]  ;;  %v2313_v53 = vpack.c.bf16 %v1222_v45, %v1221_v44  ;;  %v2345_v54 = vpack.c.bf16 %v1254_v48, %v1253_v46  ;;  %v1297_v45 = vld [vmem:[#allocation8 + $0x280] sm:$0xff]  ;;  %v1298_v46 = vld [vmem:[#allocation8 + $0x288] sm:$0xff] }
 0x153   :  { %v2315_v55 = vpack.c.bf16 %v1240_v50, %v1239_v49  ;;  %v1264_v44 = vld [vmem:[#allocation8 + $0x178] sm:$0xff]  ;;  %v1330_v48 = vld [vmem:[#allocation8 + $0x388] sm:$0xff]  ;;  %v2367_v51 = vpack.c.bf16 %v1298_v46, %v1297_v45 }
 0x154   :  { %2166 = vmatpush1.bf16.msra.mxu0 %v2165_v56  ;;  %v1223_v56 = vld [vmem:[#allocation8 + $0x30] sm:$0xff] }
 0x155   :  { %2294 = vmatpush1.bf16.msra.mxu1 %v2293_v57  ;;  %2168 = vmatprep.subr.bf16.mxu0 %v2167_v58  ;;  %v1224_v57 = vld [vmem:[#allocation8 + $0x38] sm:$0xff]  ;;  %v1255_v58 = vld [vmem:[#allocation8 + $0x130] sm:$0xff] }
 0x156   :  { %2296 = vmatprep.subr.bf16.mxu1 %v2295_v61  ;;  %v1242_v61 = vld [vmem:[#allocation8 + $0xc8] sm:$0xff]  ;;  %v2317_v24 = vpack.c.bf16 %v1224_v57, %v1223_v56  ;;  %v2349_v0 = vpack.c.bf16 %v1256_v60, %v1255_v58  ;;  %v2714_v56 = vld [vmem:[#allocation7] sm:$0xff] }
 0x157   :  { %v2319_v1 = vpack.c.bf16 %v1242_v61, %v1241_v16 }
 0x158   :  { %2170 = vmatpush1.bf16.msra.mxu0 %v2169_v2  ;;  %v1225_v2 = vld [vmem:[#allocation8 + $0x40] sm:$0xff] }
 0x159   :  { %2298 = vmatpush1.bf16.msra.mxu1 %v2297_v3  ;;  %2172 = vmatprep.subr.bf16.mxu0 %v2171_v4  ;;  %v1226_v3 = vld [vmem:[#allocation8 + $0x48] sm:$0xff]  ;;  %v1257_v4 = vld [vmem:[#allocation8 + $0x140] sm:$0xff] }
 0x15a   :  { %2300 = vmatprep.subr.bf16.mxu1 %v2299_v8  ;;  %v1244_v8 = vld [vmem:[#allocation8 + $0xd8] sm:$0xff]  ;;  %v2321_v11 = vpack.c.bf16 %v1226_v3, %v1225_v2  ;;  %v2353_v12 = vpack.c.bf16 %v1258_v6, %v1257_v4  ;;  %v1281_v2 = vld [vmem:[#allocation8 + $0x200] sm:$0xff]  ;;  %v1282_v3 = vld [vmem:[#allocation8 + $0x208] sm:$0xff] }
 0x15b   :  { %v2323_v13 = vpack.c.bf16 %v1244_v8, %v1243_v7  ;;  %v1313_v4 = vld [vmem:[#allocation8 + $0x300] sm:$0xff]  ;;  %v1314_v8 = vld [vmem:[#allocation8 + $0x308] sm:$0xff] }
 0x15c   :  { %2174 = vmatpush1.bf16.msra.mxu0 %v2173_v14  ;;  %v1227_v14 = vld [vmem:[#allocation8 + $0x50] sm:$0xff] }
 0x15d   :  { %2302 = vmatpush1.bf16.msra.mxu1 %v2301_v15  ;;  %2304 = vmatprep.subr.bf16.mxu0 %v2303_v17  ;;  %v1228_v15 = vld [vmem:[#allocation8 + $0x58] sm:$0xff]  ;;  %v1259_v17 = vld [vmem:[#allocation8 + $0x150] sm:$0xff] }
 0x15e   :  { %2336 = vmatprep.subr.bf16.mxu1 %v2335_v21  ;;  %v1246_v21 = vld [vmem:[#allocation8 + $0xe8] sm:$0xff]  ;;  %v2325_v25 = vpack.c.bf16 %v1228_v15, %v1227_v14  ;;  %v2357_v26 = vpack.c.bf16 %v1260_v19, %v1259_v17  ;;  %v2369_v15 = vpack.c.bf16 %v1282_v3, %v1281_v2  ;;  %v2401_v19 = vpack.c.bf16 %v1314_v8, %v1313_v4  ;;  %v1339_v2 = vld [vmem:[#allocation8 + $0x3d0] sm:$0xff]  ;;  %v1340_v3 = vld [vmem:[#allocation8 + $0x3d8] sm:$0xff] }
 0x15f   :  { %1061 = vmatmul.mubr.f32.vlgmr.msra.gmra.mrb[2].mxu0 %v2458_v38  ;;  %v2327_v27 = vpack.c.bf16 %v1246_v21, %v1245_v20  ;;  %v2371_v20 = vpack.c.bf16 %v1300_v10, %v1299_v9  ;;  %v1283_v21 = vld [vmem:[#allocation8 + $0x210] sm:$0xff]  ;;  %v1292_v8 = vld [vmem:[#allocation8 + $0x258] sm:$0xff]  ;;  %v2419_v10 = vpack.c.bf16 %v1340_v3, %v1339_v2 }
 0x160   :  { %1203 = vmatmul.mubr.f32.vlgmr.msra.gmra.mrb[2].mxu1 %v2458_v38  ;;  %2306 = vmatpush3.bf16.msra.mxu0 %v2305_v28  ;;  %v1229_v28 = vld [vmem:[#allocation8 + $0x60] sm:$0xff]  ;;  %v1323_v9 = vld [vmem:[#allocation8 + $0x350] sm:$0xff] }
 0x161   :  { %2338 = vmatpush3.bf16.msra.mxu1 %v2337_v29  ;;  %2308 = vmatprep.subr.bf16.mxu0 %v2307_v30  ;;  %v1230_v29 = vld [vmem:[#allocation8 + $0x68] sm:$0xff]  ;;  %v1261_v30 = vld [vmem:[#allocation8 + $0x160] sm:$0xff] }
 0x162   :  { %2340 = vmatprep.subr.bf16.mxu1 %v2339_v34  ;;  %v1248_v34 = vld [vmem:[#allocation8 + $0xf8] sm:$0xff]  ;;  %v2329_v37 = vpack.c.bf16 %v1230_v29, %v1229_v28  ;;  %v2361_v38 = vpack.c.bf16 %v1262_v32, %v1261_v30  ;;  %v1301_v28 = vld [vmem:[#allocation8 + $0x2a0] sm:$0xff]  ;;  %v1302_v29 = vld [vmem:[#allocation8 + $0x2a8] sm:$0xff]  ;;  %v2373_v32 = vpack.c.bf16 %v1284_v22, %v1283_v21 }
 0x163   :  { %v2331_v39 = vpack.c.bf16 %v1248_v34, %v1247_v33  ;;  %v1333_v30 = vld [vmem:[#allocation8 + $0x3a0] sm:$0xff]  ;;  %v2375_v34 = vpack.c.bf16 %v1302_v29, %v1301_v28  ;;  %v1294_v21 = vld [vmem:[#allocation8 + $0x268] sm:$0xff]  ;;  %v1343_v28 = vld [vmem:[#allocation8 + $0x3f0] sm:$0xff] }
 0x164   :  { %2310 = vmatpush3.bf16.msra.mxu0 %v2309_v41  ;;  %v1232_v41 = vld [vmem:[#allocation8 + $0x78] sm:$0xff]  ;;  %v1325_v22 = vld [vmem:[#allocation8 + $0x360] sm:$0xff] }
 0x165   :  { %2342 = vmatpush3.bf16.msra.mxu1 %v2341_v42  ;;  %2312 = vmatprep.subr.bf16.mxu0 %v2311_v43  ;;  %v1263_v42 = vld [vmem:[#allocation8 + $0x170] sm:$0xff]  ;;  %v2363_v43 = vpack.c.bf16 %v1280_v36, %v1279_v35  ;;  %v2333_v49 = vpack.c.bf16 %v1232_v41, %v1231_v40  ;;  %v1285_v35 = vld [vmem:[#allocation8 + $0x220] sm:$0xff]  ;;  %v1286_v36 = vld [vmem:[#allocation8 + $0x228] sm:$0xff] }
 0x166   :  { %2344 = vmatprep.subr.bf16.mxu1 %v2343_v47  ;;  %v1329_v47 = vld [vmem:[#allocation8 + $0x380] sm:$0xff]  ;;  %v2365_v50 = vpack.c.bf16 %v1264_v44, %v1263_v42  ;;  %v1303_v40 = vld [vmem:[#allocation8 + $0x2b0] sm:$0xff]  ;;  %v1304_v41 = vld [vmem:[#allocation8 + $0x2b8] sm:$0xff]  ;;  %v2377_v44 = vpack.c.bf16 %v1286_v36, %v1285_v35 }
 0x167   :  { %v2399_v52 = vpack.c.bf16 %v1330_v48, %v1329_v47  ;;  %v1335_v42 = vld [vmem:[#allocation8 + $0x3b0] sm:$0xff]  ;;  %v2379_v46 = vpack.c.bf16 %v1304_v41, %v1303_v40  ;;  %v1288_v48 = vld [vmem:[#allocation8 + $0x238] sm:$0xff] }
 0x168   :  { %2314 = vmatpush3.bf16.msra.mxu0 %v2313_v53  ;;  %v601_v53 = vlaneseq  ;;  %v1287_v47 = vld [vmem:[#allocation8 + $0x230] sm:$0xff]  ;;  %v1344_v29 = vld [vmem:[#allocation8 + $0x3f8] sm:$0xff] }
 0x169   :  { %2346 = vmatpush3.bf16.msra.mxu1 %v2345_v54  ;;  %2316 = vmatprep.subr.bf16.mxu0 %v2315_v55  ;;  %v2427_v35 = vpack.c.bf16 %v1344_v29, %v1343_v28  ;;  %v1327_v36 = vld [vmem:[#allocation8 + $0x370] sm:$0xff] }
 0x16a   :  { %2348 = vmatprep.subr.bf16.mxu1 %v2347_v59  ;;  %v2711_v54 = vshrl.u32 %v601_v53, 7  ;;  %v1306_v53 = vld [vmem:[#allocation8 + $0x2c8] sm:$0xff] }
 0x16c   :  { %2318 = vmatpush3.bf16.msra.mxu0 %v2317_v24  ;;  %v603_v55 = vsub.s32 0, %v2711_v54  ;;  %v611_v57 = vsub.s32 2, %v2711_v54  ;;  %v607_v58 = vsub.s32 1, %v2711_v54  ;;  %v615_v59 = vsub.s32 3, %v2711_v54 }
 0x16d   :  { %2350 = vmatpush3.bf16.msra.mxu1 %v2349_v0  ;;  %2320 = vmatprep.subr.bf16.mxu0 %v2319_v1  ;;  %v619_v40 = vsub.s32 4, %v2711_v54  ;;  %v627_v41 = vsub.s32 6, %v2711_v54 }
 0x16e   :  { %2352 = vmatprep.subr.bf16.mxu1 %v2351_v5  ;;  %v604_v60 = vrot.slane %v2714_v56, %v603_v55  ;;  %v612_v16 = vrot.slane %v2714_v56, %v611_v57  ;;  %v608_v61 = vrot.slane %v2714_v56, %v607_v58  ;;  %v616_v62 = vrot.slane %v2714_v56, %v615_v59  ;;  %v1337_v55 = vld [vmem:[#allocation8 + $0x3c0] sm:$0xff]  ;;  %v1338_v57 = vld [vmem:[#allocation8 + $0x3c8] sm:$0xff] }
 0x16f   :  { %v2381_v58 = vpack.c.bf16 %v1288_v48, %v1287_v47 }
 0x170   :  { %2322 = vmatpush3.bf16.msra.mxu0 %v2321_v11 }
 0x171   :  { %2354 = vmatpush3.bf16.msra.mxu1 %v2353_v12  ;;  %2324 = vmatprep.subr.bf16.mxu0 %v2323_v13  ;;  %v1331_v12 = vld [vmem:[#allocation8 + $0x390] sm:$0xff]  ;;  %v1332_v13 = vld [vmem:[#allocation8 + $0x398] sm:$0xff] }
 0x172   :  { %2356 = vmatprep.subr.bf16.mxu1 %v2355_v18 }
 0x174   :  { %2326 = vmatpush3.bf16.msra.mxu0 %v2325_v25 }
 0x175   :  { %2358 = vmatpush3.bf16.msra.mxu1 %v2357_v26  ;;  %2328 = vmatprep.subr.bf16.mxu0 %v2327_v27  ;;  %v2403_v26 = vpack.c.bf16 %v1332_v13, %v1331_v12  ;;  %v1316_v27 = vld [vmem:[#allocation8 + $0x318] sm:$0xff]  ;;  %v1309_v12 = vld [vmem:[#allocation8 + $0x2e0] sm:$0xff]  ;;  %v1310_v13 = vld [vmem:[#allocation8 + $0x2e8] sm:$0xff] }
 0x176   :  { %2360 = vmatprep.subr.bf16.mxu1 %v2359_v31  ;;  %v1334_v31 = vld [vmem:[#allocation8 + $0x3a8] sm:$0xff]  ;;  %v2405_v33 = vpack.c.bf16 %v1316_v27, %v1315_v23  ;;  %v1312_v27 = vld [vmem:[#allocation8 + $0x2f8] sm:$0xff] }
 0x178   :  { %2330 = vmatpush3.bf16.msra.mxu0 %v2329_v37  ;;  %v1317_v37 = vld [vmem:[#allocation8 + $0x320] sm:$0xff] }
 0x179   :  { %2362 = vmatpush3.bf16.msra.mxu1 %v2361_v38  ;;  %2332 = vmatprep.subr.bf16.mxu0 %v2331_v39  ;;  %v2407_v38 = vpack.c.bf16 %v1334_v31, %v1333_v30  ;;  %v1318_v39 = vld [vmem:[#allocation8 + $0x328] sm:$0xff] }
 0x17a   :  { %2364 = vmatprep.subr.bf16.mxu1 %v2363_v43  ;;  %v1336_v43 = vld [vmem:[#allocation8 + $0x3b8] sm:$0xff]  ;;  %v2409_v45 = vpack.c.bf16 %v1318_v39, %v1317_v37 }
 0x17b   :  { %v1328_v37 = vld [vmem:[#allocation8 + $0x378] sm:$0xff] }
 0x17c   :  { %2334 = vmatpush3.bf16.msra.mxu0 %v2333_v49  ;;  %v1319_v49 = vld [vmem:[#allocation8 + $0x330] sm:$0xff]  ;;  %v2429_v39 = vpack.c.bf16 %v1328_v37, %v1327_v36 }
 0x17d   :  { %2366 = vmatpush3.bf16.msra.mxu1 %v2365_v50  ;;  %2368 = vmatprep.subr.bf16.mxu0 %v2367_v51  ;;  %v2411_v50 = vpack.c.bf16 %v1336_v43, %v1335_v42  ;;  %v1320_v51 = vld [vmem:[#allocation8 + $0x338] sm:$0xff]  ;;  %v623_v42 = vsub.s32 5, %v2711_v54  ;;  %v631_v43 = vsub.s32 7, %v2711_v54 }
 0x17e   :  { %2400 = vmatprep.subr.bf16.mxu1 %v2399_v52  ;;  %v1305_v52 = vld [vmem:[#allocation8 + $0x2c0] sm:$0xff]  ;;  %v2413_v59 = vpack.c.bf16 %v1320_v51, %v1319_v49 }
 0x17f   :  { %v632_v47 = vrot.slane %v2714_v56, %v631_v43 }
 0x1b2   :  { %v778_v63 = vpop.f32.mrb[0].mxu0 }
 0x1b3   :  { %v2431_v24 = vadd.f32 %v778_v63, %v604_v60  ;;  %v920_v0 = vpop.f32.mrb[0].mxu1  ;;  %v780_v1 = vpop.f32.mrb[1].mxu0  ;;  %v2383_v60 = vpack.c.bf16 %v1306_v53, %v1305_v52  ;;  %v2415_v63 = vpack.c.bf16 %v1338_v57, %v1337_v55 }
 0x1b4   :  { %v2433_v5 = vadd.f32 %v920_v0, %v612_v16  ;;  %v2432_v6 = vadd.f32 %v780_v1, %v608_v61  ;;  %v922_v7 = vpop.f32.mrb[1].mxu1  ;;  %v1289_v16 = vld [vmem:[#allocation8 + $0x240] sm:$0xff]  ;;  %v1290_v61 = vld [vmem:[#allocation8 + $0x248] sm:$0xff]  ;;  %v1307_v0 = vld [vmem:[#allocation8 + $0x2d0] sm:$0xff] }
 0x1b5   :  { %v2434_v11 = vadd.f32 %v922_v7, %v616_v62  ;;  %v1209_v17 = vmax.f32 %v2431_v24, 0.0  ;;  %v1321_v62 = vld [vmem:[#allocation8 + $0x340] sm:$0xff]  ;;  %v1322_v24 = vld [vmem:[#allocation8 + $0x348] sm:$0xff]  ;;  %v1308_v1 = vld [vmem:[#allocation8 + $0x2d8] sm:$0xff]  ;;  %v2385_v4 = vpack.c.bf16 %v1290_v61, %v1289_v16 }
 0x1b6   :  { %v1210_v14 = vmax.f32 %v2432_v6, 0.0  ;;  %v1211_v25 = vmax.f32 %v2433_v5, 0.0  ;;  %v2417_v5 = vpack.c.bf16 %v1322_v24, %v1321_v62  ;;  %v2387_v6 = vpack.c.bf16 %v1308_v1, %v1307_v0  ;;  %v1291_v7 = vld [vmem:[#allocation8 + $0x250] sm:$0xff]  ;;  %v1650_v62 = vld [vmem:[#allocation10] ss:$0 sm:$0xff] }
 0x1b7   :  { %v1212_v18 = vmax.f32 %v2434_v11, 0.0  ;;  %v1324_v11 = vld [vmem:[#allocation8 + $0x358] sm:$0xff] }
 0x1b8   :  { %1416 = vmatprep.mubr.f32.mxu0 %v1210_v14  ;;  %v1341_v14 = vld [vmem:[#allocation8 + $0x3e0] sm:$0xff] }
 0x1b9   :  { %1486 = vmatprep.mubr.f32.mxu1 %v1212_v18  ;;  %1417 = vmatmul.mubr.f32.vlgmr.msra.gmra.mrb[4].mxu0 %v1209_v17  ;;  %v2389_v17 = vpack.c.bf16 %v1292_v8, %v1291_v7  ;;  %v2421_v18 = vpack.c.bf16 %v1324_v11, %v1323_v9 }
 0x1ba   :  { %1487 = vmatmul.mubr.f32.vlgmr.msra.gmra.mrb[4].mxu1 %v1211_v25  ;;  %2370 = vmatpush3.bf16.msra.mxu0 %v2369_v15  ;;  %v1342_v15 = vld [vmem:[#allocation8 + $0x3e8] sm:$0xff] }
 0x1bb   :  { %2402 = vmatpush3.bf16.msra.mxu1 %v2401_v19  ;;  %2372 = vmatprep.subr.bf16.mxu0 %v2371_v20  ;;  %v2391_v19 = vpack.c.bf16 %v1310_v13, %v1309_v12  ;;  %v1293_v20 = vld [vmem:[#allocation8 + $0x260] sm:$0xff]  ;;  %v2423_v23 = vpack.c.bf16 %v1342_v15, %v1341_v14  ;;  %v1326_v25 = vld [vmem:[#allocation8 + $0x368] sm:$0xff] }
 0x1bc   :  { %2404 = vmatprep.subr.bf16.mxu1 %v2403_v26  ;;  %v1311_v26 = vld [vmem:[#allocation8 + $0x2f0] sm:$0xff]  ;;  %v2393_v30 = vpack.c.bf16 %v1294_v21, %v1293_v20  ;;  %v2425_v31 = vpack.c.bf16 %v1326_v25, %v1325_v22 }
 0x1be   :  { %2374 = vmatpush3.bf16.msra.mxu0 %v2373_v32  ;;  %v2395_v32 = vpack.c.bf16 %v1312_v27, %v1311_v26 }
 0x1bf   :  { %2406 = vmatpush3.bf16.msra.mxu1 %v2405_v33  ;;  %2376 = vmatprep.subr.bf16.mxu0 %v2375_v34  ;;  %v1295_v33 = vld [vmem:[#allocation8 + $0x270] sm:$0xff]  ;;  %v1296_v34 = vld [vmem:[#allocation8 + $0x278] sm:$0xff] }
 0x1c0   :  { %2408 = vmatprep.subr.bf16.mxu1 %v2407_v38  ;;  %v2397_v38 = vpack.c.bf16 %v1296_v34, %v1295_v33 }
 0x1c2   :  { %2378 = vmatpush3.bf16.msra.mxu0 %v2377_v44  ;;  %v620_v44 = vrot.slane %v2714_v56, %v619_v40 }
 0x1c3   :  { %2410 = vmatpush3.bf16.msra.mxu1 %v2409_v45  ;;  %2380 = vmatprep.subr.bf16.mxu0 %v2379_v46  ;;  %v628_v45 = vrot.slane %v2714_v56, %v627_v41  ;;  %v624_v46 = vrot.slane %v2714_v56, %v623_v42 }
 0x1c4   :  { %2412 = vmatprep.subr.bf16.mxu1 %v2411_v50 }
 0x1c6   :  { %2382 = vmatpush3.bf16.msra.mxu0 %v2381_v58 }
 0x1c7   :  { %2414 = vmatpush3.bf16.msra.mxu1 %v2413_v59  ;;  %2384 = vmatprep.subr.bf16.mxu0 %v2383_v60 }
 0x1c8   :  { %2416 = vmatprep.subr.bf16.mxu1 %v2415_v63 }
 0x1ca   :  { %2386 = vmatpush3.bf16.msra.mxu0 %v2385_v4 }
 0x1cb   :  { %2418 = vmatpush3.bf16.msra.mxu1 %v2417_v5  ;;  %2388 = vmatprep.subr.bf16.mxu0 %v2387_v6 }
 0x1cc   :  { %2420 = vmatprep.subr.bf16.mxu1 %v2419_v10 }
 0x1ce   :  { %2390 = vmatpush3.bf16.msra.mxu0 %v2389_v17 }
 0x1cf   :  { %2422 = vmatpush3.bf16.msra.mxu1 %v2421_v18  ;;  %2392 = vmatprep.subr.bf16.mxu0 %v2391_v19 }
 0x1d0   :  { %2424 = vmatprep.subr.bf16.mxu1 %v2423_v23 }
 0x1d2   :  { %2394 = vmatpush3.bf16.msra.mxu0 %v2393_v30 }
 0x1d3   :  { %2426 = vmatpush3.bf16.msra.mxu1 %v2425_v31  ;;  %2396 = vmatprep.subr.bf16.mxu0 %v2395_v32 }
 0x1d4   :  { %2428 = vmatprep.subr.bf16.mxu1 %v2427_v35 }
 0x1d6   :  { %2398 = vmatpush3.bf16.msra.mxu0 %v2397_v38 }
 0x1d7   :  { %2430 = vmatpush3.bf16.msra.mxu1 %v2429_v39 }
 0x232   :  { %v1062_v48 = vpop.f32.mrb[2].mxu0 }
 0x233   :  { %v2435_v49 = vadd.f32 %v1062_v48, %v620_v44  ;;  %v1204_v50 = vpop.f32.mrb[2].mxu1  ;;  %v1064_v51 = vpop.f32.mrb[3].mxu0 }
 0x234   :  { %v2437_v52 = vadd.f32 %v1204_v50, %v628_v45  ;;  %v2436_v53 = vadd.f32 %v1064_v51, %v624_v46  ;;  %v1206_v55 = vpop.f32.mrb[3].mxu1 }
 0x235   :  { %v2438_v57 = vadd.f32 %v1206_v55, %v632_v47  ;;  %v1213_v59 = vmax.f32 %v2435_v49, 0.0 }
 0x236   :  { %v1214_v58 = vmax.f32 %v2436_v53, 0.0  ;;  %v1215_v54 = vmax.f32 %v2437_v52, 0.0 }
 0x237   :  { %v1216_v60 = vmax.f32 %v2438_v57, 0.0 }
 0x238   :  { %1556 = vmatprep.mubr.f32.mxu0 %v1214_v58 }
 0x239   :  { %1626 = vmatprep.mubr.f32.mxu1 %v1216_v60  ;;  %1557 = vmatmul.mubr.f32.vlgmr.msra.gmra.mrb[6].mxu0 %v1213_v59 }
 0x23a   :  { %1627 = vmatmul.mubr.f32.vlgmr.msra.gmra.mrb[6].mxu1 %v1215_v54 }
 0x28c   :  { %v1683_v16 = vpop.f32.mrb[4].mxu0 }
 0x28d   :  { %v1718_v61 = vpop.f32.mrb[4].mxu1  ;;  %v1684_v56 = vpop.f32.mrb[5].mxu0 }
 0x28e   :  { %v1685_v63 = vadd.f32 %v1684_v56, %v1683_v16  ;;  %v1719_v24 = vpop.f32.mrb[5].mxu1 }
 0x28f   :  { %v1720_v0 = vadd.f32 %v1719_v24, %v1718_v61 }
 0x290   :  { %v1419_v1 = vadd.f32 %v1685_v63, %v1650_v62 }
 0x292   :  { %v1489_v2 = vadd.f32 %v1720_v0, %v1419_v1 }
 0x30c   :  { %v1753_v3 = vpop.f32.mrb[6].mxu0 }
 0x30d   :  { %v1788_v4 = vpop.f32.mrb[6].mxu1  ;;  %v1754_v5 = vpop.f32.mrb[7].mxu0 }
 0x30e   :  { %v1755_v6 = vadd.f32 %v1754_v5, %v1753_v3  ;;  %v1789_v7 = vpop.f32.mrb[7].mxu1 }
 0x30f   :  { %v1790_v8 = vadd.f32 %v1789_v7, %v1788_v4 }
 0x310   :  { %v1559_v9 = vadd.f32 %v1755_v6, %v1489_v2 }
 0x312   :  { %v1629_v10 = vadd.f32 %v1790_v8, %v1559_v9 }
 0x314   :  { %1632 = vst [vmem:[#allocation11] sm:$0xff] %v1629_v10 }
 0x315   :  { %2580 = shalt.err (!%p2577_p2)
}
 0x316   :  { %s2581_s6 = scalar_lea.hbm %s2748_s5, 128 }
 0x317   :  { %p2582_p3 = scmp.ne.s32.totalorder %s2748_s5, %s2581_s6  ;;  %p2585_p4 = scmp.lt.u32.totalorder %s2581_s6, %s2748_s5 }
 0x319   :  { %p2587_p5 = pnand %p2585_p4, %p2582_p3 }
 0x31b   :  { %2590 = shalt.err (!%p2587_p5)
}
 0x31c   :  { %1642 = dma.vmem_to_hbm [thread:$0]  %s1640_s28, 128, %s2748_s5, [#allocation4]  }
 0x31d   :  { %2597 = dma.done.wait [#allocation4], 128  }
 0x31e   :  { %2598 = vsyncadd [#allocation4], 4294967168 }
 0x31f   :  { %1646 = vsyncpa [#allocation3], 1 }
 0x320   :  { %1647 = vsyncpa [#allocation6], 1 }
 0x321   :  { %1648 = vsyncpa [#allocation9], 1 }
 0x322   :  { %1649 = vsyncpa [#allocation4], 1 }

</bundles_post_ra>
